<compile_context>
chip_gen: v6e
topology: v6e:2x2x1
jax: 0.10.0
libtpu: 0.0.40
codegen_flags: <defaults>
</compile_context>

<pallas_src>
import functools

import jax
import jax.numpy as jnp
import numpy as np
from jax.experimental import pallas as pl
from jax.experimental.pallas import tpu as pltpu


def dst_head_kernel(xT_ref, wT_ref, gamma_ref, alpha_ref, u_ref, o_ref):
    # Per-tile shapes: xT (F, TB) batch-on-lanes; wT (F, P, 1); gamma/alpha (P, 1);
    # u (P, C, 1); out (C+1, TB).
    F, TB = xT_ref.shape
    P = gamma_ref.shape[0]
    C = u_ref.shape[1]

    # ---- Distance_layer: ED[p, b] = sum_f (w[p,f] - x[b,f])^2  (exact f32, VPU) ----
    # Dense (P, TB) accumulator; one (1, TB) row of the x tile is re-sliced from
    # VMEM per feature so no (F, TB) value is ever held live in vregs (review #2).
    ed = jnp.zeros((P, TB), jnp.float32)
    for f in range(F):                                        # static unroll, F small
        d = wT_ref[f] - xT_ref[pl.ds(f, 1), :]                # (P, 1) - (1, TB) -> (P, TB)
        ed = ed + d * d

    # ---- DistanceActivation_layer ----
    si = jnp.exp(-(gamma_ref[...] * ed)) * alpha_ref[...]     # (P, TB)
    mx = jnp.max(si, axis=0, keepdims=True)                   # (1, TB): one reduce/tile
    si = si * (1.0 / (mx + 0.0001))

    # ---- Belief_layer + Omega_layer + Dempster_layer, streamed per prototype ----
    # Class masses kept dense (C, TB), ignorance mass (1, TB); no 3-D tensor,
    # no concat, no per-iteration renormalization (deferred to the end).
    def proto_mass(p):
        s = si[p:p + 1, :]                                    # (1, TB)
        m_c = u_ref[p] * s                                    # (C, 1) * (1, TB) -> (C, TB)
        o = 1.0 - jnp.sum(m_c, axis=0, keepdims=True)         # Omega_layer: (1, TB)
        return m_c, o

    m1_c, o1 = proto_mass(0)
    for p in range(1, P):                                     # static unroll
        m2_c, o2 = proto_mass(p)
        m1_c = m1_c * m2_c + m1_c * o2 + o1 * m2_c            # class columns
        o1 = 3.0 * (o1 * o2)                                  # reference's omega-column update

    # ---- DempsterNormalize_layer: single divide per tile, two lane-dense stores ----
    total = jnp.sum(m1_c, axis=0, keepdims=True) + o1         # (1, TB)
    inv = 1.0 / total
    o_ref[pl.ds(0, C), :] = m1_c * inv                        # class rows
    o_ref[pl.ds(C, 1), :] = o1 * inv                          # omega row


@functools.partial(jax.jit, static_argnames=("tb",))
def _dst_head(x, w, eta, xi, beta, *, tb):
    """x: (B, F), w: (P, F), eta/xi: (1, P), beta: (C, P) -> (B, C+1)."""
    x = jnp.asarray(x, jnp.float32)
    B, F = x.shape
    P, _ = w.shape
    C = beta.shape[0]

    # Tiny parameter transforms kept in plain JAX (glue).
    gamma = jnp.square(eta).astype(jnp.float32).reshape(P, 1)            # eta**2
    alpha = (1.0 / (jnp.exp(-xi) + 1.0)).astype(jnp.float32).reshape(P, 1)
    beta2 = jnp.square(beta).astype(jnp.float32)
    u = beta2 / jnp.sum(beta2, axis=0, keepdims=True)                    # (C, P)
    u3 = u.T.reshape(P, C, 1)
    wT = jnp.asarray(w, jnp.float32).T.reshape(F, P, 1)                  # (F, P, 1)

    # Batch on lanes: transpose, zero-pad B up to a multiple of the lane tile
    # only when needed (no pad at all for B % tb == 0, e.g. the B=256 case).
    Bp = pl.cdiv(B, tb) * tb
    xT = x.T
    if Bp != B:
        xT = jnp.pad(xT, ((0, 0), (0, Bp - B)))                          # (F, Bp)
    nb = Bp // tb

    # Advisory cost so XLA schedules the kernel against the surrounding glue ops.
    cost = pl.CostEstimate(
        flops=int(Bp) * (3 * P * F + 10 * P * C),
        transcendentals=int(Bp) * P,
        bytes_accessed=4 * (F * Bp + (C + 1) * Bp + F * P + 2 * P + P * C),
    )

    # VMEM budget note (review #5): double-buffered footprint per step is
    # ~2*(F + C+1)*tb*4 bytes (< 0.3 MiB at tb=512) — far below the 32 MiB
    # default scoped limit on v5e/v6e/v7x; tile size is bounded by vreg
    # pressure, not VMEM, on every generation.
    out_t = pl.pallas_call(
        dst_head_kernel,
        out_shape=jax.ShapeDtypeStruct((C + 1, Bp), jnp.float32),
        grid=(nb,),
        in_specs=[
            pl.BlockSpec((F, tb), lambda i: (0, i)),          # x tile (batch on lanes)
            pl.BlockSpec((F, P, 1), lambda i: (0, 0, 0)),     # prototypes (transposed), resident
            pl.BlockSpec((P, 1), lambda i: (0, 0)),           # gamma, resident
            pl.BlockSpec((P, 1), lambda i: (0, 0)),           # alpha, resident
            pl.BlockSpec((P, C, 1), lambda i: (0, 0, 0)),     # class weights, resident
        ],
        out_specs=pl.BlockSpec((C + 1, tb), lambda i: (0, i)),
        compiler_params=pltpu.CompilerParams(
            # v7x shards this axis over its 2 TensorCores; for tiny B the
            # length-1 grid consciously trades the 2nd core for one launch
            # overhead (review #4). Keep B a multiple of 2*tb for full v7x use.
            dimension_semantics=("parallel",)),
        cost_estimate=cost,
    )(xT, wT, gamma, alpha, u3)

    return out_t[:, :B].T                                     # (B, C+1)


def dempster_shafer(x, w, eta, xi, beta, *, tb=None):
    """Auto-pick the batch tile: one tile for small B, 512 lanes otherwise."""
    if tb is None:
        B = x.shape[0]
        tb = int(min(512, ((B + 127) // 128) * 128))
    return _dst_head(x, w, eta, xi, beta, tb=tb)


def reference(x, w, eta, xi, beta):
    """Literal JAX transcription of the PyTorch forward (for verification)."""
    ed = jnp.sum((w[None, :, :] - x[:, None, :]) ** 2, axis=-1)          # (B, P)
    gamma = jnp.square(eta)
    alpha = 1.0 / (jnp.exp(-xi) + 1.0)
    si = jnp.exp(-(gamma * ed)) * alpha
    si = si / (jnp.max(si, axis=-1, keepdims=True) + 0.0001)
    beta2 = jnp.square(beta)
    u = beta2 / jnp.sum(beta2, axis=0, keepdims=True)
    mass = jnp.einsum('cp,bp->bpc', u, si)
    omega = 1.0 - jnp.sum(mass, axis=-1, keepdims=True)                  # Omega_layer
    mw = jnp.concatenate([mass, omega], axis=-1)                         # Omega_layer
    m1 = mw[:, 0, :]
    o1 = m1[:, -1:]
    for i in range(w.shape[0] - 1):
        m2 = mw[:, i + 1, :]
        o2 = m2[:, -1:]
        c = m1 * m2 + m1 * o2 + o1 * m2
        c = c / jnp.sum(c, axis=-1, keepdims=True)
        m1 = c
        o1 = c[:, -1:]
    return m1 / jnp.sum(m1, axis=-1, keepdims=True)


if __name__ == "__main__":
    # batch, n_feature_maps, n_prototypes, n_classes
    B, F, P, C = 256, 32, 8, 4
    key = jax.random.PRNGKey(0)
    k1, k2, k3, k4, k5 = jax.random.split(key, 5)

    x = jax.random.normal(k1, (B, F), jnp.float32)
    w = 0.3 * jax.random.normal(k2, (P, F), jnp.float32)           # Distance_layer.w
    eta = jax.random.uniform(k3, (1, P), jnp.float32, -0.5, 0.5)   # DistanceActivation.eta
    xi = jax.random.uniform(k4, (1, P), jnp.float32, -1.0, 1.0)    # DistanceActivation.xi
    beta = jax.random.normal(k5, (C, P), jnp.float32)              # Belief_layer.beta

    out = jax.block_until_ready(dempster_shafer(x, w, eta, xi, beta))
    ref = jax.block_until_ready(reference(x, w, eta, xi, beta))

    assert out.shape == (B, C + 1)
    err = float(np.max(np.abs(np.asarray(out) - np.asarray(ref))))
    assert np.allclose(np.asarray(out), np.asarray(ref), rtol=5e-4, atol=1e-5), (
        "max abs err %g" % err)
    print("KERNEL_OK")
</pallas_src>

<mosaic_0001>
module attributes {stable_mosaic.version = 11 : i64} {
  func.func @dst_head_kernel(%arg0: i32, %arg1: memref<32x256xf32, #tpu.memory_space<vmem>>, %arg2: memref<32x8x1xf32, #tpu.memory_space<vmem>>, %arg3: memref<8x1xf32, #tpu.memory_space<vmem>>, %arg4: memref<8x1xf32, #tpu.memory_space<vmem>>, %arg5: memref<8x4x1xf32, #tpu.memory_space<vmem>>, %arg6: memref<5x256xf32, #tpu.memory_space<vmem>>) attributes {dimension_semantics = [#tpu.dimension_semantics<parallel>], iteration_bounds = array<i64: 1>, scalar_prefetch = 0 : i64, scratch_operands = 0 : i64, tpu.core_type = #tpu.core_type<tc>, window_params = [{transform_indices = @transform_0, window_bounds = array<i64: 32, 256>}, {pipeline_mode = #tpu.pipeline_mode<synchronous>, transform_indices = @transform_1, window_bounds = array<i64: 32, 8, 1>}, {pipeline_mode = #tpu.pipeline_mode<synchronous>, transform_indices = @transform_2, window_bounds = array<i64: 8, 1>}, {pipeline_mode = #tpu.pipeline_mode<synchronous>, transform_indices = @transform_3, window_bounds = array<i64: 8, 1>}, {pipeline_mode = #tpu.pipeline_mode<synchronous>, transform_indices = @transform_4, window_bounds = array<i64: 8, 4, 1>}, {transform_indices = @transform_5, window_bounds = array<i64: 5, 256>}]} {
    %cst = arith.constant 0.000000e+00 : f32
    %0 = vector.broadcast %cst : f32 to vector<8x256xf32>
    %c0 = arith.constant 0 : index
    %c0_0 = arith.constant 0 : index
    %c0_1 = arith.constant 0 : index
    %1 = vector.load %arg2[%c0, %c0_0, %c0_1] : memref<32x8x1xf32, #tpu.memory_space<vmem>>, vector<1x8x1xf32>
    %2 = vector.shape_cast %1 : vector<1x8x1xf32> to vector<8x1xf32>
    %c0_2 = arith.constant 0 : index
    %c0_3 = arith.constant 0 : index
    %3 = vector.load %arg1[%c0_2, %c0_3] : memref<32x256xf32, #tpu.memory_space<vmem>>, vector<1x256xf32>
    %4 = vector.broadcast %2 : vector<8x1xf32> to vector<8x256xf32>
    %5 = vector.broadcast %3 : vector<1x256xf32> to vector<8x256xf32>
    %6 = arith.subf %4, %5 : vector<8x256xf32>
    %7 = arith.mulf %6, %6 : vector<8x256xf32>
    %8 = arith.addf %0, %7 : vector<8x256xf32>
    %c1 = arith.constant 1 : index
    %c0_4 = arith.constant 0 : index
    %c0_5 = arith.constant 0 : index
    %9 = vector.load %arg2[%c1, %c0_4, %c0_5] : memref<32x8x1xf32, #tpu.memory_space<vmem>>, vector<1x8x1xf32>
    %10 = vector.shape_cast %9 : vector<1x8x1xf32> to vector<8x1xf32>
    %c1_6 = arith.constant 1 : index
    %c0_7 = arith.constant 0 : index
    %11 = vector.load %arg1[%c1_6, %c0_7] : memref<32x256xf32, #tpu.memory_space<vmem>>, vector<1x256xf32>
    %12 = vector.broadcast %10 : vector<8x1xf32> to vector<8x256xf32>
    %13 = vector.broadcast %11 : vector<1x256xf32> to vector<8x256xf32>
    %14 = arith.subf %12, %13 : vector<8x256xf32>
    %15 = arith.mulf %14, %14 : vector<8x256xf32>
    %16 = arith.addf %8, %15 : vector<8x256xf32>
    %c2 = arith.constant 2 : index
    %c0_8 = arith.constant 0 : index
    %c0_9 = arith.constant 0 : index
    %17 = vector.load %arg2[%c2, %c0_8, %c0_9] : memref<32x8x1xf32, #tpu.memory_space<vmem>>, vector<1x8x1xf32>
    %18 = vector.shape_cast %17 : vector<1x8x1xf32> to vector<8x1xf32>
    %c2_10 = arith.constant 2 : index
    %c0_11 = arith.constant 0 : index
    %19 = vector.load %arg1[%c2_10, %c0_11] : memref<32x256xf32, #tpu.memory_space<vmem>>, vector<1x256xf32>
    %20 = vector.broadcast %18 : vector<8x1xf32> to vector<8x256xf32>
    %21 = vector.broadcast %19 : vector<1x256xf32> to vector<8x256xf32>
    %22 = arith.subf %20, %21 : vector<8x256xf32>
    %23 = arith.mulf %22, %22 : vector<8x256xf32>
    %24 = arith.addf %16, %23 : vector<8x256xf32>
    %c3 = arith.constant 3 : index
    %c0_12 = arith.constant 0 : index
    %c0_13 = arith.constant 0 : index
    %25 = vector.load %arg2[%c3, %c0_12, %c0_13] : memref<32x8x1xf32, #tpu.memory_space<vmem>>, vector<1x8x1xf32>
    %26 = vector.shape_cast %25 : vector<1x8x1xf32> to vector<8x1xf32>
    %c3_14 = arith.constant 3 : index
    %c0_15 = arith.constant 0 : index
    %27 = vector.load %arg1[%c3_14, %c0_15] : memref<32x256xf32, #tpu.memory_space<vmem>>, vector<1x256xf32>
    %28 = vector.broadcast %26 : vector<8x1xf32> to vector<8x256xf32>
    %29 = vector.broadcast %27 : vector<1x256xf32> to vector<8x256xf32>
    %30 = arith.subf %28, %29 : vector<8x256xf32>
    %31 = arith.mulf %30, %30 : vector<8x256xf32>
    %32 = arith.addf %24, %31 : vector<8x256xf32>
    %c4 = arith.constant 4 : index
    %c0_16 = arith.constant 0 : index
    %c0_17 = arith.constant 0 : index
    %33 = vector.load %arg2[%c4, %c0_16, %c0_17] : memref<32x8x1xf32, #tpu.memory_space<vmem>>, vector<1x8x1xf32>
    %34 = vector.shape_cast %33 : vector<1x8x1xf32> to vector<8x1xf32>
    %c4_18 = arith.constant 4 : index
    %c0_19 = arith.constant 0 : index
    %35 = vector.load %arg1[%c4_18, %c0_19] : memref<32x256xf32, #tpu.memory_space<vmem>>, vector<1x256xf32>
    %36 = vector.broadcast %34 : vector<8x1xf32> to vector<8x256xf32>
    %37 = vector.broadcast %35 : vector<1x256xf32> to vector<8x256xf32>
    %38 = arith.subf %36, %37 : vector<8x256xf32>
    %39 = arith.mulf %38, %38 : vector<8x256xf32>
    %40 = arith.addf %32, %39 : vector<8x256xf32>
    %c5 = arith.constant 5 : index
    %c0_20 = arith.constant 0 : index
    %c0_21 = arith.constant 0 : index
    %41 = vector.load %arg2[%c5, %c0_20, %c0_21] : memref<32x8x1xf32, #tpu.memory_space<vmem>>, vector<1x8x1xf32>
    %42 = vector.shape_cast %41 : vector<1x8x1xf32> to vector<8x1xf32>
    %c5_22 = arith.constant 5 : index
    %c0_23 = arith.constant 0 : index
    %43 = vector.load %arg1[%c5_22, %c0_23] : memref<32x256xf32, #tpu.memory_space<vmem>>, vector<1x256xf32>
    %44 = vector.broadcast %42 : vector<8x1xf32> to vector<8x256xf32>
    %45 = vector.broadcast %43 : vector<1x256xf32> to vector<8x256xf32>
    %46 = arith.subf %44, %45 : vector<8x256xf32>
    %47 = arith.mulf %46, %46 : vector<8x256xf32>
    %48 = arith.addf %40, %47 : vector<8x256xf32>
    %c6 = arith.constant 6 : index
    %c0_24 = arith.constant 0 : index
    %c0_25 = arith.constant 0 : index
    %49 = vector.load %arg2[%c6, %c0_24, %c0_25] : memref<32x8x1xf32, #tpu.memory_space<vmem>>, vector<1x8x1xf32>
    %50 = vector.shape_cast %49 : vector<1x8x1xf32> to vector<8x1xf32>
    %c6_26 = arith.constant 6 : index
    %c0_27 = arith.constant 0 : index
    %51 = vector.load %arg1[%c6_26, %c0_27] : memref<32x256xf32, #tpu.memory_space<vmem>>, vector<1x256xf32>
    %52 = vector.broadcast %50 : vector<8x1xf32> to vector<8x256xf32>
    %53 = vector.broadcast %51 : vector<1x256xf32> to vector<8x256xf32>
    %54 = arith.subf %52, %53 : vector<8x256xf32>
    %55 = arith.mulf %54, %54 : vector<8x256xf32>
    %56 = arith.addf %48, %55 : vector<8x256xf32>
    %c7 = arith.constant 7 : index
    %c0_28 = arith.constant 0 : index
    %c0_29 = arith.constant 0 : index
    %57 = vector.load %arg2[%c7, %c0_28, %c0_29] : memref<32x8x1xf32, #tpu.memory_space<vmem>>, vector<1x8x1xf32>
    %58 = vector.shape_cast %57 : vector<1x8x1xf32> to vector<8x1xf32>
    %c7_30 = arith.constant 7 : index
    %c0_31 = arith.constant 0 : index
    %59 = vector.load %arg1[%c7_30, %c0_31] : memref<32x256xf32, #tpu.memory_space<vmem>>, vector<1x256xf32>
    %60 = vector.broadcast %58 : vector<8x1xf32> to vector<8x256xf32>
    %61 = vector.broadcast %59 : vector<1x256xf32> to vector<8x256xf32>
    %62 = arith.subf %60, %61 : vector<8x256xf32>
    %63 = arith.mulf %62, %62 : vector<8x256xf32>
    %64 = arith.addf %56, %63 : vector<8x256xf32>
    %c8 = arith.constant 8 : index
    %c0_32 = arith.constant 0 : index
    %c0_33 = arith.constant 0 : index
    %65 = vector.load %arg2[%c8, %c0_32, %c0_33] : memref<32x8x1xf32, #tpu.memory_space<vmem>>, vector<1x8x1xf32>
    %66 = vector.shape_cast %65 : vector<1x8x1xf32> to vector<8x1xf32>
    %c8_34 = arith.constant 8 : index
    %c0_35 = arith.constant 0 : index
    %67 = vector.load %arg1[%c8_34, %c0_35] : memref<32x256xf32, #tpu.memory_space<vmem>>, vector<1x256xf32>
    %68 = vector.broadcast %66 : vector<8x1xf32> to vector<8x256xf32>
    %69 = vector.broadcast %67 : vector<1x256xf32> to vector<8x256xf32>
    %70 = arith.subf %68, %69 : vector<8x256xf32>
    %71 = arith.mulf %70, %70 : vector<8x256xf32>
    %72 = arith.addf %64, %71 : vector<8x256xf32>
    %c9 = arith.constant 9 : index
    %c0_36 = arith.constant 0 : index
    %c0_37 = arith.constant 0 : index
    %73 = vector.load %arg2[%c9, %c0_36, %c0_37] : memref<32x8x1xf32, #tpu.memory_space<vmem>>, vector<1x8x1xf32>
    %74 = vector.shape_cast %73 : vector<1x8x1xf32> to vector<8x1xf32>
    %c9_38 = arith.constant 9 : index
    %c0_39 = arith.constant 0 : index
    %75 = vector.load %arg1[%c9_38, %c0_39] : memref<32x256xf32, #tpu.memory_space<vmem>>, vector<1x256xf32>
    %76 = vector.broadcast %74 : vector<8x1xf32> to vector<8x256xf32>
    %77 = vector.broadcast %75 : vector<1x256xf32> to vector<8x256xf32>
    %78 = arith.subf %76, %77 : vector<8x256xf32>
    %79 = arith.mulf %78, %78 : vector<8x256xf32>
    %80 = arith.addf %72, %79 : vector<8x256xf32>
    %c10 = arith.constant 10 : index
    %c0_40 = arith.constant 0 : index
    %c0_41 = arith.constant 0 : index
    %81 = vector.load %arg2[%c10, %c0_40, %c0_41] : memref<32x8x1xf32, #tpu.memory_space<vmem>>, vector<1x8x1xf32>
    %82 = vector.shape_cast %81 : vector<1x8x1xf32> to vector<8x1xf32>
    %c10_42 = arith.constant 10 : index
    %c0_43 = arith.constant 0 : index
    %83 = vector.load %arg1[%c10_42, %c0_43] : memref<32x256xf32, #tpu.memory_space<vmem>>, vector<1x256xf32>
    %84 = vector.broadcast %82 : vector<8x1xf32> to vector<8x256xf32>
    %85 = vector.broadcast %83 : vector<1x256xf32> to vector<8x256xf32>
    %86 = arith.subf %84, %85 : vector<8x256xf32>
    %87 = arith.mulf %86, %86 : vector<8x256xf32>
    %88 = arith.addf %80, %87 : vector<8x256xf32>
    %c11 = arith.constant 11 : index
    %c0_44 = arith.constant 0 : index
    %c0_45 = arith.constant 0 : index
    %89 = vector.load %arg2[%c11, %c0_44, %c0_45] : memref<32x8x1xf32, #tpu.memory_space<vmem>>, vector<1x8x1xf32>
    %90 = vector.shape_cast %89 : vector<1x8x1xf32> to vector<8x1xf32>
    %c11_46 = arith.constant 11 : index
    %c0_47 = arith.constant 0 : index
    %91 = vector.load %arg1[%c11_46, %c0_47] : memref<32x256xf32, #tpu.memory_space<vmem>>, vector<1x256xf32>
    %92 = vector.broadcast %90 : vector<8x1xf32> to vector<8x256xf32>
    %93 = vector.broadcast %91 : vector<1x256xf32> to vector<8x256xf32>
    %94 = arith.subf %92, %93 : vector<8x256xf32>
    %95 = arith.mulf %94, %94 : vector<8x256xf32>
    %96 = arith.addf %88, %95 : vector<8x256xf32>
    %c12 = arith.constant 12 : index
    %c0_48 = arith.constant 0 : index
    %c0_49 = arith.constant 0 : index
    %97 = vector.load %arg2[%c12, %c0_48, %c0_49] : memref<32x8x1xf32, #tpu.memory_space<vmem>>, vector<1x8x1xf32>
    %98 = vector.shape_cast %97 : vector<1x8x1xf32> to vector<8x1xf32>
    %c12_50 = arith.constant 12 : index
    %c0_51 = arith.constant 0 : index
    %99 = vector.load %arg1[%c12_50, %c0_51] : memref<32x256xf32, #tpu.memory_space<vmem>>, vector<1x256xf32>
    %100 = vector.broadcast %98 : vector<8x1xf32> to vector<8x256xf32>
    %101 = vector.broadcast %99 : vector<1x256xf32> to vector<8x256xf32>
    %102 = arith.subf %100, %101 : vector<8x256xf32>
    %103 = arith.mulf %102, %102 : vector<8x256xf32>
    %104 = arith.addf %96, %103 : vector<8x256xf32>
    %c13 = arith.constant 13 : index
    %c0_52 = arith.constant 0 : index
    %c0_53 = arith.constant 0 : index
    %105 = vector.load %arg2[%c13, %c0_52, %c0_53] : memref<32x8x1xf32, #tpu.memory_space<vmem>>, vector<1x8x1xf32>
    %106 = vector.shape_cast %105 : vector<1x8x1xf32> to vector<8x1xf32>
    %c13_54 = arith.constant 13 : index
    %c0_55 = arith.constant 0 : index
    %107 = vector.load %arg1[%c13_54, %c0_55] : memref<32x256xf32, #tpu.memory_space<vmem>>, vector<1x256xf32>
    %108 = vector.broadcast %106 : vector<8x1xf32> to vector<8x256xf32>
    %109 = vector.broadcast %107 : vector<1x256xf32> to vector<8x256xf32>
    %110 = arith.subf %108, %109 : vector<8x256xf32>
    %111 = arith.mulf %110, %110 : vector<8x256xf32>
    %112 = arith.addf %104, %111 : vector<8x256xf32>
    %c14 = arith.constant 14 : index
    %c0_56 = arith.constant 0 : index
    %c0_57 = arith.constant 0 : index
    %113 = vector.load %arg2[%c14, %c0_56, %c0_57] : memref<32x8x1xf32, #tpu.memory_space<vmem>>, vector<1x8x1xf32>
    %114 = vector.shape_cast %113 : vector<1x8x1xf32> to vector<8x1xf32>
    %c14_58 = arith.constant 14 : index
    %c0_59 = arith.constant 0 : index
    %115 = vector.load %arg1[%c14_58, %c0_59] : memref<32x256xf32, #tpu.memory_space<vmem>>, vector<1x256xf32>
    %116 = vector.broadcast %114 : vector<8x1xf32> to vector<8x256xf32>
    %117 = vector.broadcast %115 : vector<1x256xf32> to vector<8x256xf32>
    %118 = arith.subf %116, %117 : vector<8x256xf32>
    %119 = arith.mulf %118, %118 : vector<8x256xf32>
    %120 = arith.addf %112, %119 : vector<8x256xf32>
    %c15 = arith.constant 15 : index
    %c0_60 = arith.constant 0 : index
    %c0_61 = arith.constant 0 : index
    %121 = vector.load %arg2[%c15, %c0_60, %c0_61] : memref<32x8x1xf32, #tpu.memory_space<vmem>>, vector<1x8x1xf32>
    %122 = vector.shape_cast %121 : vector<1x8x1xf32> to vector<8x1xf32>
    %c15_62 = arith.constant 15 : index
    %c0_63 = arith.constant 0 : index
    %123 = vector.load %arg1[%c15_62, %c0_63] : memref<32x256xf32, #tpu.memory_space<vmem>>, vector<1x256xf32>
    %124 = vector.broadcast %122 : vector<8x1xf32> to vector<8x256xf32>
    %125 = vector.broadcast %123 : vector<1x256xf32> to vector<8x256xf32>
    %126 = arith.subf %124, %125 : vector<8x256xf32>
    %127 = arith.mulf %126, %126 : vector<8x256xf32>
    %128 = arith.addf %120, %127 : vector<8x256xf32>
    %c16 = arith.constant 16 : index
    %c0_64 = arith.constant 0 : index
    %c0_65 = arith.constant 0 : index
    %129 = vector.load %arg2[%c16, %c0_64, %c0_65] : memref<32x8x1xf32, #tpu.memory_space<vmem>>, vector<1x8x1xf32>
    %130 = vector.shape_cast %129 : vector<1x8x1xf32> to vector<8x1xf32>
    %c16_66 = arith.constant 16 : index
    %c0_67 = arith.constant 0 : index
    %131 = vector.load %arg1[%c16_66, %c0_67] : memref<32x256xf32, #tpu.memory_space<vmem>>, vector<1x256xf32>
    %132 = vector.broadcast %130 : vector<8x1xf32> to vector<8x256xf32>
    %133 = vector.broadcast %131 : vector<1x256xf32> to vector<8x256xf32>
    %134 = arith.subf %132, %133 : vector<8x256xf32>
    %135 = arith.mulf %134, %134 : vector<8x256xf32>
    %136 = arith.addf %128, %135 : vector<8x256xf32>
    %c17 = arith.constant 17 : index
    %c0_68 = arith.constant 0 : index
    %c0_69 = arith.constant 0 : index
    %137 = vector.load %arg2[%c17, %c0_68, %c0_69] : memref<32x8x1xf32, #tpu.memory_space<vmem>>, vector<1x8x1xf32>
    %138 = vector.shape_cast %137 : vector<1x8x1xf32> to vector<8x1xf32>
    %c17_70 = arith.constant 17 : index
    %c0_71 = arith.constant 0 : index
    %139 = vector.load %arg1[%c17_70, %c0_71] : memref<32x256xf32, #tpu.memory_space<vmem>>, vector<1x256xf32>
    %140 = vector.broadcast %138 : vector<8x1xf32> to vector<8x256xf32>
    %141 = vector.broadcast %139 : vector<1x256xf32> to vector<8x256xf32>
    %142 = arith.subf %140, %141 : vector<8x256xf32>
    %143 = arith.mulf %142, %142 : vector<8x256xf32>
    %144 = arith.addf %136, %143 : vector<8x256xf32>
    %c18 = arith.constant 18 : index
    %c0_72 = arith.constant 0 : index
    %c0_73 = arith.constant 0 : index
    %145 = vector.load %arg2[%c18, %c0_72, %c0_73] : memref<32x8x1xf32, #tpu.memory_space<vmem>>, vector<1x8x1xf32>
    %146 = vector.shape_cast %145 : vector<1x8x1xf32> to vector<8x1xf32>
    %c18_74 = arith.constant 18 : index
    %c0_75 = arith.constant 0 : index
    %147 = vector.load %arg1[%c18_74, %c0_75] : memref<32x256xf32, #tpu.memory_space<vmem>>, vector<1x256xf32>
    %148 = vector.broadcast %146 : vector<8x1xf32> to vector<8x256xf32>
    %149 = vector.broadcast %147 : vector<1x256xf32> to vector<8x256xf32>
    %150 = arith.subf %148, %149 : vector<8x256xf32>
    %151 = arith.mulf %150, %150 : vector<8x256xf32>
    %152 = arith.addf %144, %151 : vector<8x256xf32>
    %c19 = arith.constant 19 : index
    %c0_76 = arith.constant 0 : index
    %c0_77 = arith.constant 0 : index
    %153 = vector.load %arg2[%c19, %c0_76, %c0_77] : memref<32x8x1xf32, #tpu.memory_space<vmem>>, vector<1x8x1xf32>
    %154 = vector.shape_cast %153 : vector<1x8x1xf32> to vector<8x1xf32>
    %c19_78 = arith.constant 19 : index
    %c0_79 = arith.constant 0 : index
    %155 = vector.load %arg1[%c19_78, %c0_79] : memref<32x256xf32, #tpu.memory_space<vmem>>, vector<1x256xf32>
    %156 = vector.broadcast %154 : vector<8x1xf32> to vector<8x256xf32>
    %157 = vector.broadcast %155 : vector<1x256xf32> to vector<8x256xf32>
    %158 = arith.subf %156, %157 : vector<8x256xf32>
    %159 = arith.mulf %158, %158 : vector<8x256xf32>
    %160 = arith.addf %152, %159 : vector<8x256xf32>
    %c20 = arith.constant 20 : index
    %c0_80 = arith.constant 0 : index
    %c0_81 = arith.constant 0 : index
    %161 = vector.load %arg2[%c20, %c0_80, %c0_81] : memref<32x8x1xf32, #tpu.memory_space<vmem>>, vector<1x8x1xf32>
    %162 = vector.shape_cast %161 : vector<1x8x1xf32> to vector<8x1xf32>
    %c20_82 = arith.constant 20 : index
    %c0_83 = arith.constant 0 : index
    %163 = vector.load %arg1[%c20_82, %c0_83] : memref<32x256xf32, #tpu.memory_space<vmem>>, vector<1x256xf32>
    %164 = vector.broadcast %162 : vector<8x1xf32> to vector<8x256xf32>
    %165 = vector.broadcast %163 : vector<1x256xf32> to vector<8x256xf32>
    %166 = arith.subf %164, %165 : vector<8x256xf32>
    %167 = arith.mulf %166, %166 : vector<8x256xf32>
    %168 = arith.addf %160, %167 : vector<8x256xf32>
    %c21 = arith.constant 21 : index
    %c0_84 = arith.constant 0 : index
    %c0_85 = arith.constant 0 : index
    %169 = vector.load %arg2[%c21, %c0_84, %c0_85] : memref<32x8x1xf32, #tpu.memory_space<vmem>>, vector<1x8x1xf32>
    %170 = vector.shape_cast %169 : vector<1x8x1xf32> to vector<8x1xf32>
    %c21_86 = arith.constant 21 : index
    %c0_87 = arith.constant 0 : index
    %171 = vector.load %arg1[%c21_86, %c0_87] : memref<32x256xf32, #tpu.memory_space<vmem>>, vector<1x256xf32>
    %172 = vector.broadcast %170 : vector<8x1xf32> to vector<8x256xf32>
    %173 = vector.broadcast %171 : vector<1x256xf32> to vector<8x256xf32>
    %174 = arith.subf %172, %173 : vector<8x256xf32>
    %175 = arith.mulf %174, %174 : vector<8x256xf32>
    %176 = arith.addf %168, %175 : vector<8x256xf32>
    %c22 = arith.constant 22 : index
    %c0_88 = arith.constant 0 : index
    %c0_89 = arith.constant 0 : index
    %177 = vector.load %arg2[%c22, %c0_88, %c0_89] : memref<32x8x1xf32, #tpu.memory_space<vmem>>, vector<1x8x1xf32>
    %178 = vector.shape_cast %177 : vector<1x8x1xf32> to vector<8x1xf32>
    %c22_90 = arith.constant 22 : index
    %c0_91 = arith.constant 0 : index
    %179 = vector.load %arg1[%c22_90, %c0_91] : memref<32x256xf32, #tpu.memory_space<vmem>>, vector<1x256xf32>
    %180 = vector.broadcast %178 : vector<8x1xf32> to vector<8x256xf32>
    %181 = vector.broadcast %179 : vector<1x256xf32> to vector<8x256xf32>
    %182 = arith.subf %180, %181 : vector<8x256xf32>
    %183 = arith.mulf %182, %182 : vector<8x256xf32>
    %184 = arith.addf %176, %183 : vector<8x256xf32>
    %c23 = arith.constant 23 : index
    %c0_92 = arith.constant 0 : index
    %c0_93 = arith.constant 0 : index
    %185 = vector.load %arg2[%c23, %c0_92, %c0_93] : memref<32x8x1xf32, #tpu.memory_space<vmem>>, vector<1x8x1xf32>
    %186 = vector.shape_cast %185 : vector<1x8x1xf32> to vector<8x1xf32>
    %c23_94 = arith.constant 23 : index
    %c0_95 = arith.constant 0 : index
    %187 = vector.load %arg1[%c23_94, %c0_95] : memref<32x256xf32, #tpu.memory_space<vmem>>, vector<1x256xf32>
    %188 = vector.broadcast %186 : vector<8x1xf32> to vector<8x256xf32>
    %189 = vector.broadcast %187 : vector<1x256xf32> to vector<8x256xf32>
    %190 = arith.subf %188, %189 : vector<8x256xf32>
    %191 = arith.mulf %190, %190 : vector<8x256xf32>
    %192 = arith.addf %184, %191 : vector<8x256xf32>
    %c24 = arith.constant 24 : index
    %c0_96 = arith.constant 0 : index
    %c0_97 = arith.constant 0 : index
    %193 = vector.load %arg2[%c24, %c0_96, %c0_97] : memref<32x8x1xf32, #tpu.memory_space<vmem>>, vector<1x8x1xf32>
    %194 = vector.shape_cast %193 : vector<1x8x1xf32> to vector<8x1xf32>
    %c24_98 = arith.constant 24 : index
    %c0_99 = arith.constant 0 : index
    %195 = vector.load %arg1[%c24_98, %c0_99] : memref<32x256xf32, #tpu.memory_space<vmem>>, vector<1x256xf32>
    %196 = vector.broadcast %194 : vector<8x1xf32> to vector<8x256xf32>
    %197 = vector.broadcast %195 : vector<1x256xf32> to vector<8x256xf32>
    %198 = arith.subf %196, %197 : vector<8x256xf32>
    %199 = arith.mulf %198, %198 : vector<8x256xf32>
    %200 = arith.addf %192, %199 : vector<8x256xf32>
    %c25 = arith.constant 25 : index
    %c0_100 = arith.constant 0 : index
    %c0_101 = arith.constant 0 : index
    %201 = vector.load %arg2[%c25, %c0_100, %c0_101] : memref<32x8x1xf32, #tpu.memory_space<vmem>>, vector<1x8x1xf32>
    %202 = vector.shape_cast %201 : vector<1x8x1xf32> to vector<8x1xf32>
    %c25_102 = arith.constant 25 : index
    %c0_103 = arith.constant 0 : index
    %203 = vector.load %arg1[%c25_102, %c0_103] : memref<32x256xf32, #tpu.memory_space<vmem>>, vector<1x256xf32>
    %204 = vector.broadcast %202 : vector<8x1xf32> to vector<8x256xf32>
    %205 = vector.broadcast %203 : vector<1x256xf32> to vector<8x256xf32>
    %206 = arith.subf %204, %205 : vector<8x256xf32>
    %207 = arith.mulf %206, %206 : vector<8x256xf32>
    %208 = arith.addf %200, %207 : vector<8x256xf32>
    %c26 = arith.constant 26 : index
    %c0_104 = arith.constant 0 : index
    %c0_105 = arith.constant 0 : index
    %209 = vector.load %arg2[%c26, %c0_104, %c0_105] : memref<32x8x1xf32, #tpu.memory_space<vmem>>, vector<1x8x1xf32>
    %210 = vector.shape_cast %209 : vector<1x8x1xf32> to vector<8x1xf32>
    %c26_106 = arith.constant 26 : index
    %c0_107 = arith.constant 0 : index
    %211 = vector.load %arg1[%c26_106, %c0_107] : memref<32x256xf32, #tpu.memory_space<vmem>>, vector<1x256xf32>
    %212 = vector.broadcast %210 : vector<8x1xf32> to vector<8x256xf32>
    %213 = vector.broadcast %211 : vector<1x256xf32> to vector<8x256xf32>
    %214 = arith.subf %212, %213 : vector<8x256xf32>
    %215 = arith.mulf %214, %214 : vector<8x256xf32>
    %216 = arith.addf %208, %215 : vector<8x256xf32>
    %c27 = arith.constant 27 : index
    %c0_108 = arith.constant 0 : index
    %c0_109 = arith.constant 0 : index
    %217 = vector.load %arg2[%c27, %c0_108, %c0_109] : memref<32x8x1xf32, #tpu.memory_space<vmem>>, vector<1x8x1xf32>
    %218 = vector.shape_cast %217 : vector<1x8x1xf32> to vector<8x1xf32>
    %c27_110 = arith.constant 27 : index
    %c0_111 = arith.constant 0 : index
    %219 = vector.load %arg1[%c27_110, %c0_111] : memref<32x256xf32, #tpu.memory_space<vmem>>, vector<1x256xf32>
    %220 = vector.broadcast %218 : vector<8x1xf32> to vector<8x256xf32>
    %221 = vector.broadcast %219 : vector<1x256xf32> to vector<8x256xf32>
    %222 = arith.subf %220, %221 : vector<8x256xf32>
    %223 = arith.mulf %222, %222 : vector<8x256xf32>
    %224 = arith.addf %216, %223 : vector<8x256xf32>
    %c28 = arith.constant 28 : index
    %c0_112 = arith.constant 0 : index
    %c0_113 = arith.constant 0 : index
    %225 = vector.load %arg2[%c28, %c0_112, %c0_113] : memref<32x8x1xf32, #tpu.memory_space<vmem>>, vector<1x8x1xf32>
    %226 = vector.shape_cast %225 : vector<1x8x1xf32> to vector<8x1xf32>
    %c28_114 = arith.constant 28 : index
    %c0_115 = arith.constant 0 : index
    %227 = vector.load %arg1[%c28_114, %c0_115] : memref<32x256xf32, #tpu.memory_space<vmem>>, vector<1x256xf32>
    %228 = vector.broadcast %226 : vector<8x1xf32> to vector<8x256xf32>
    %229 = vector.broadcast %227 : vector<1x256xf32> to vector<8x256xf32>
    %230 = arith.subf %228, %229 : vector<8x256xf32>
    %231 = arith.mulf %230, %230 : vector<8x256xf32>
    %232 = arith.addf %224, %231 : vector<8x256xf32>
    %c29 = arith.constant 29 : index
    %c0_116 = arith.constant 0 : index
    %c0_117 = arith.constant 0 : index
    %233 = vector.load %arg2[%c29, %c0_116, %c0_117] : memref<32x8x1xf32, #tpu.memory_space<vmem>>, vector<1x8x1xf32>
    %234 = vector.shape_cast %233 : vector<1x8x1xf32> to vector<8x1xf32>
    %c29_118 = arith.constant 29 : index
    %c0_119 = arith.constant 0 : index
    %235 = vector.load %arg1[%c29_118, %c0_119] : memref<32x256xf32, #tpu.memory_space<vmem>>, vector<1x256xf32>
    %236 = vector.broadcast %234 : vector<8x1xf32> to vector<8x256xf32>
    %237 = vector.broadcast %235 : vector<1x256xf32> to vector<8x256xf32>
    %238 = arith.subf %236, %237 : vector<8x256xf32>
    %239 = arith.mulf %238, %238 : vector<8x256xf32>
    %240 = arith.addf %232, %239 : vector<8x256xf32>
    %c30 = arith.constant 30 : index
    %c0_120 = arith.constant 0 : index
    %c0_121 = arith.constant 0 : index
    %241 = vector.load %arg2[%c30, %c0_120, %c0_121] : memref<32x8x1xf32, #tpu.memory_space<vmem>>, vector<1x8x1xf32>
    %242 = vector.shape_cast %241 : vector<1x8x1xf32> to vector<8x1xf32>
    %c30_122 = arith.constant 30 : index
    %c0_123 = arith.constant 0 : index
    %243 = vector.load %arg1[%c30_122, %c0_123] : memref<32x256xf32, #tpu.memory_space<vmem>>, vector<1x256xf32>
    %244 = vector.broadcast %242 : vector<8x1xf32> to vector<8x256xf32>
    %245 = vector.broadcast %243 : vector<1x256xf32> to vector<8x256xf32>
    %246 = arith.subf %244, %245 : vector<8x256xf32>
    %247 = arith.mulf %246, %246 : vector<8x256xf32>
    %248 = arith.addf %240, %247 : vector<8x256xf32>
    %c31 = arith.constant 31 : index
    %c0_124 = arith.constant 0 : index
    %c0_125 = arith.constant 0 : index
    %249 = vector.load %arg2[%c31, %c0_124, %c0_125] : memref<32x8x1xf32, #tpu.memory_space<vmem>>, vector<1x8x1xf32>
    %250 = vector.shape_cast %249 : vector<1x8x1xf32> to vector<8x1xf32>
    %c31_126 = arith.constant 31 : index
    %c0_127 = arith.constant 0 : index
    %251 = vector.load %arg1[%c31_126, %c0_127] : memref<32x256xf32, #tpu.memory_space<vmem>>, vector<1x256xf32>
    %252 = vector.broadcast %250 : vector<8x1xf32> to vector<8x256xf32>
    %253 = vector.broadcast %251 : vector<1x256xf32> to vector<8x256xf32>
    %254 = arith.subf %252, %253 : vector<8x256xf32>
    %255 = arith.mulf %254, %254 : vector<8x256xf32>
    %256 = arith.addf %248, %255 : vector<8x256xf32>
    %c0_128 = arith.constant 0 : index
    %c0_129 = arith.constant 0 : index
    %257 = vector.load %arg3[%c0_128, %c0_129] : memref<8x1xf32, #tpu.memory_space<vmem>>, vector<8x1xf32>
    %258 = vector.broadcast %257 : vector<8x1xf32> to vector<8x256xf32>
    %259 = arith.mulf %258, %256 : vector<8x256xf32>
    %cst_130 = arith.constant 0.000000e+00 : f32
    %260 = vector.broadcast %cst_130 : f32 to vector<8x256xf32>
    %261 = arith.subf %260, %259 : vector<8x256xf32>
    %262 = math.exp %261 : vector<8x256xf32>
    %c0_131 = arith.constant 0 : index
    %c0_132 = arith.constant 0 : index
    %263 = vector.load %arg4[%c0_131, %c0_132] : memref<8x1xf32, #tpu.memory_space<vmem>>, vector<8x1xf32>
    %264 = vector.broadcast %263 : vector<8x1xf32> to vector<8x256xf32>
    %265 = arith.mulf %262, %264 : vector<8x256xf32>
    %cst_133 = arith.constant dense<0xFF800000> : vector<256xf32>
    %266 = vector.multi_reduction <maximumf>, %265, %cst_133 [0] : vector<8x256xf32> to vector<256xf32>
    %267 = vector.shape_cast %266 : vector<256xf32> to vector<1x256xf32>
    %cst_134 = arith.constant 9.99999974E-5 : f32
    %268 = vector.broadcast %cst_134 : f32 to vector<1x256xf32>
    %269 = arith.addf %267, %268 : vector<1x256xf32>
    %cst_135 = arith.constant 1.000000e+00 : f32
    %270 = vector.broadcast %cst_135 : f32 to vector<1x256xf32>
    %271 = arith.divf %270, %269 : vector<1x256xf32>
    %272 = vector.broadcast %271 : vector<1x256xf32> to vector<8x256xf32>
    %273 = arith.mulf %265, %272 : vector<8x256xf32>
    %274 = vector.extract_strided_slice %273 {offsets = [0, 0], sizes = [1, 256], strides = [1, 1]} : vector<8x256xf32> to vector<1x256xf32>
    %c0_136 = arith.constant 0 : index
    %c0_137 = arith.constant 0 : index
    %c0_138 = arith.constant 0 : index
    %275 = vector.load %arg5[%c0_136, %c0_137, %c0_138] : memref<8x4x1xf32, #tpu.memory_space<vmem>>, vector<1x4x1xf32>
    %276 = vector.shape_cast %275 : vector<1x4x1xf32> to vector<4x1xf32>
    %277 = vector.broadcast %276 : vector<4x1xf32> to vector<4x256xf32>
    %278 = vector.broadcast %274 : vector<1x256xf32> to vector<4x256xf32>
    %279 = arith.mulf %277, %278 : vector<4x256xf32>
    %cst_139 = arith.constant dense<0.000000e+00> : vector<256xf32>
    %280 = vector.multi_reduction <add>, %279, %cst_139 [0] : vector<4x256xf32> to vector<256xf32>
    %281 = vector.shape_cast %280 : vector<256xf32> to vector<1x256xf32>
    %cst_140 = arith.constant 1.000000e+00 : f32
    %282 = vector.broadcast %cst_140 : f32 to vector<1x256xf32>
    %283 = arith.subf %282, %281 : vector<1x256xf32>
    %284 = vector.extract_strided_slice %273 {offsets = [1, 0], sizes = [1, 256], strides = [1, 1]} : vector<8x256xf32> to vector<1x256xf32>
    %c1_141 = arith.constant 1 : index
    %c0_142 = arith.constant 0 : index
    %c0_143 = arith.constant 0 : index
    %285 = vector.load %arg5[%c1_141, %c0_142, %c0_143] : memref<8x4x1xf32, #tpu.memory_space<vmem>>, vector<1x4x1xf32>
    %286 = vector.shape_cast %285 : vector<1x4x1xf32> to vector<4x1xf32>
    %287 = vector.broadcast %286 : vector<4x1xf32> to vector<4x256xf32>
    %288 = vector.broadcast %284 : vector<1x256xf32> to vector<4x256xf32>
    %289 = arith.mulf %287, %288 : vector<4x256xf32>
    %cst_144 = arith.constant dense<0.000000e+00> : vector<256xf32>
    %290 = vector.multi_reduction <add>, %289, %cst_144 [0] : vector<4x256xf32> to vector<256xf32>
    %291 = vector.shape_cast %290 : vector<256xf32> to vector<1x256xf32>
    %cst_145 = arith.constant 1.000000e+00 : f32
    %292 = vector.broadcast %cst_145 : f32 to vector<1x256xf32>
    %293 = arith.subf %292, %291 : vector<1x256xf32>
    %294 = arith.mulf %279, %289 : vector<4x256xf32>
    %295 = vector.broadcast %293 : vector<1x256xf32> to vector<4x256xf32>
    %296 = arith.mulf %279, %295 : vector<4x256xf32>
    %297 = arith.addf %294, %296 : vector<4x256xf32>
    %298 = vector.broadcast %283 : vector<1x256xf32> to vector<4x256xf32>
    %299 = arith.mulf %298, %289 : vector<4x256xf32>
    %300 = arith.addf %297, %299 : vector<4x256xf32>
    %301 = arith.mulf %283, %293 : vector<1x256xf32>
    %cst_146 = arith.constant 3.000000e+00 : f32
    %302 = vector.broadcast %cst_146 : f32 to vector<1x256xf32>
    %303 = arith.mulf %302, %301 : vector<1x256xf32>
    %304 = vector.extract_strided_slice %273 {offsets = [2, 0], sizes = [1, 256], strides = [1, 1]} : vector<8x256xf32> to vector<1x256xf32>
    %c2_147 = arith.constant 2 : index
    %c0_148 = arith.constant 0 : index
    %c0_149 = arith.constant 0 : index
    %305 = vector.load %arg5[%c2_147, %c0_148, %c0_149] : memref<8x4x1xf32, #tpu.memory_space<vmem>>, vector<1x4x1xf32>
    %306 = vector.shape_cast %305 : vector<1x4x1xf32> to vector<4x1xf32>
    %307 = vector.broadcast %306 : vector<4x1xf32> to vector<4x256xf32>
    %308 = vector.broadcast %304 : vector<1x256xf32> to vector<4x256xf32>
    %309 = arith.mulf %307, %308 : vector<4x256xf32>
    %cst_150 = arith.constant dense<0.000000e+00> : vector<256xf32>
    %310 = vector.multi_reduction <add>, %309, %cst_150 [0] : vector<4x256xf32> to vector<256xf32>
    %311 = vector.shape_cast %310 : vector<256xf32> to vector<1x256xf32>
    %cst_151 = arith.constant 1.000000e+00 : f32
    %312 = vector.broadcast %cst_151 : f32 to vector<1x256xf32>
    %313 = arith.subf %312, %311 : vector<1x256xf32>
    %314 = arith.mulf %300, %309 : vector<4x256xf32>
    %315 = vector.broadcast %313 : vector<1x256xf32> to vector<4x256xf32>
    %316 = arith.mulf %300, %315 : vector<4x256xf32>
    %317 = arith.addf %314, %316 : vector<4x256xf32>
    %318 = vector.broadcast %303 : vector<1x256xf32> to vector<4x256xf32>
    %319 = arith.mulf %318, %309 : vector<4x256xf32>
    %320 = arith.addf %317, %319 : vector<4x256xf32>
    %321 = arith.mulf %303, %313 : vector<1x256xf32>
    %cst_152 = arith.constant 3.000000e+00 : f32
    %322 = vector.broadcast %cst_152 : f32 to vector<1x256xf32>
    %323 = arith.mulf %322, %321 : vector<1x256xf32>
    %324 = vector.extract_strided_slice %273 {offsets = [3, 0], sizes = [1, 256], strides = [1, 1]} : vector<8x256xf32> to vector<1x256xf32>
    %c3_153 = arith.constant 3 : index
    %c0_154 = arith.constant 0 : index
    %c0_155 = arith.constant 0 : index
    %325 = vector.load %arg5[%c3_153, %c0_154, %c0_155] : memref<8x4x1xf32, #tpu.memory_space<vmem>>, vector<1x4x1xf32>
    %326 = vector.shape_cast %325 : vector<1x4x1xf32> to vector<4x1xf32>
    %327 = vector.broadcast %326 : vector<4x1xf32> to vector<4x256xf32>
    %328 = vector.broadcast %324 : vector<1x256xf32> to vector<4x256xf32>
    %329 = arith.mulf %327, %328 : vector<4x256xf32>
    %cst_156 = arith.constant dense<0.000000e+00> : vector<256xf32>
    %330 = vector.multi_reduction <add>, %329, %cst_156 [0] : vector<4x256xf32> to vector<256xf32>
    %331 = vector.shape_cast %330 : vector<256xf32> to vector<1x256xf32>
    %cst_157 = arith.constant 1.000000e+00 : f32
    %332 = vector.broadcast %cst_157 : f32 to vector<1x256xf32>
    %333 = arith.subf %332, %331 : vector<1x256xf32>
    %334 = arith.mulf %320, %329 : vector<4x256xf32>
    %335 = vector.broadcast %333 : vector<1x256xf32> to vector<4x256xf32>
    %336 = arith.mulf %320, %335 : vector<4x256xf32>
    %337 = arith.addf %334, %336 : vector<4x256xf32>
    %338 = vector.broadcast %323 : vector<1x256xf32> to vector<4x256xf32>
    %339 = arith.mulf %338, %329 : vector<4x256xf32>
    %340 = arith.addf %337, %339 : vector<4x256xf32>
    %341 = arith.mulf %323, %333 : vector<1x256xf32>
    %cst_158 = arith.constant 3.000000e+00 : f32
    %342 = vector.broadcast %cst_158 : f32 to vector<1x256xf32>
    %343 = arith.mulf %342, %341 : vector<1x256xf32>
    %344 = vector.extract_strided_slice %273 {offsets = [4, 0], sizes = [1, 256], strides = [1, 1]} : vector<8x256xf32> to vector<1x256xf32>
    %c4_159 = arith.constant 4 : index
    %c0_160 = arith.constant 0 : index
    %c0_161 = arith.constant 0 : index
    %345 = vector.load %arg5[%c4_159, %c0_160, %c0_161] : memref<8x4x1xf32, #tpu.memory_space<vmem>>, vector<1x4x1xf32>
    %346 = vector.shape_cast %345 : vector<1x4x1xf32> to vector<4x1xf32>
    %347 = vector.broadcast %346 : vector<4x1xf32> to vector<4x256xf32>
    %348 = vector.broadcast %344 : vector<1x256xf32> to vector<4x256xf32>
    %349 = arith.mulf %347, %348 : vector<4x256xf32>
    %cst_162 = arith.constant dense<0.000000e+00> : vector<256xf32>
    %350 = vector.multi_reduction <add>, %349, %cst_162 [0] : vector<4x256xf32> to vector<256xf32>
    %351 = vector.shape_cast %350 : vector<256xf32> to vector<1x256xf32>
    %cst_163 = arith.constant 1.000000e+00 : f32
    %352 = vector.broadcast %cst_163 : f32 to vector<1x256xf32>
    %353 = arith.subf %352, %351 : vector<1x256xf32>
    %354 = arith.mulf %340, %349 : vector<4x256xf32>
    %355 = vector.broadcast %353 : vector<1x256xf32> to vector<4x256xf32>
    %356 = arith.mulf %340, %355 : vector<4x256xf32>
    %357 = arith.addf %354, %356 : vector<4x256xf32>
    %358 = vector.broadcast %343 : vector<1x256xf32> to vector<4x256xf32>
    %359 = arith.mulf %358, %349 : vector<4x256xf32>
    %360 = arith.addf %357, %359 : vector<4x256xf32>
    %361 = arith.mulf %343, %353 : vector<1x256xf32>
    %cst_164 = arith.constant 3.000000e+00 : f32
    %362 = vector.broadcast %cst_164 : f32 to vector<1x256xf32>
    %363 = arith.mulf %362, %361 : vector<1x256xf32>
    %364 = vector.extract_strided_slice %273 {offsets = [5, 0], sizes = [1, 256], strides = [1, 1]} : vector<8x256xf32> to vector<1x256xf32>
    %c5_165 = arith.constant 5 : index
    %c0_166 = arith.constant 0 : index
    %c0_167 = arith.constant 0 : index
    %365 = vector.load %arg5[%c5_165, %c0_166, %c0_167] : memref<8x4x1xf32, #tpu.memory_space<vmem>>, vector<1x4x1xf32>
    %366 = vector.shape_cast %365 : vector<1x4x1xf32> to vector<4x1xf32>
    %367 = vector.broadcast %366 : vector<4x1xf32> to vector<4x256xf32>
    %368 = vector.broadcast %364 : vector<1x256xf32> to vector<4x256xf32>
    %369 = arith.mulf %367, %368 : vector<4x256xf32>
    %cst_168 = arith.constant dense<0.000000e+00> : vector<256xf32>
    %370 = vector.multi_reduction <add>, %369, %cst_168 [0] : vector<4x256xf32> to vector<256xf32>
    %371 = vector.shape_cast %370 : vector<256xf32> to vector<1x256xf32>
    %cst_169 = arith.constant 1.000000e+00 : f32
    %372 = vector.broadcast %cst_169 : f32 to vector<1x256xf32>
    %373 = arith.subf %372, %371 : vector<1x256xf32>
    %374 = arith.mulf %360, %369 : vector<4x256xf32>
    %375 = vector.broadcast %373 : vector<1x256xf32> to vector<4x256xf32>
    %376 = arith.mulf %360, %375 : vector<4x256xf32>
    %377 = arith.addf %374, %376 : vector<4x256xf32>
    %378 = vector.broadcast %363 : vector<1x256xf32> to vector<4x256xf32>
    %379 = arith.mulf %378, %369 : vector<4x256xf32>
    %380 = arith.addf %377, %379 : vector<4x256xf32>
    %381 = arith.mulf %363, %373 : vector<1x256xf32>
    %cst_170 = arith.constant 3.000000e+00 : f32
    %382 = vector.broadcast %cst_170 : f32 to vector<1x256xf32>
    %383 = arith.mulf %382, %381 : vector<1x256xf32>
    %384 = vector.extract_strided_slice %273 {offsets = [6, 0], sizes = [1, 256], strides = [1, 1]} : vector<8x256xf32> to vector<1x256xf32>
    %c6_171 = arith.constant 6 : index
    %c0_172 = arith.constant 0 : index
    %c0_173 = arith.constant 0 : index
    %385 = vector.load %arg5[%c6_171, %c0_172, %c0_173] : memref<8x4x1xf32, #tpu.memory_space<vmem>>, vector<1x4x1xf32>
    %386 = vector.shape_cast %385 : vector<1x4x1xf32> to vector<4x1xf32>
    %387 = vector.broadcast %386 : vector<4x1xf32> to vector<4x256xf32>
    %388 = vector.broadcast %384 : vector<1x256xf32> to vector<4x256xf32>
    %389 = arith.mulf %387, %388 : vector<4x256xf32>
    %cst_174 = arith.constant dense<0.000000e+00> : vector<256xf32>
    %390 = vector.multi_reduction <add>, %389, %cst_174 [0] : vector<4x256xf32> to vector<256xf32>
    %391 = vector.shape_cast %390 : vector<256xf32> to vector<1x256xf32>
    %cst_175 = arith.constant 1.000000e+00 : f32
    %392 = vector.broadcast %cst_175 : f32 to vector<1x256xf32>
    %393 = arith.subf %392, %391 : vector<1x256xf32>
    %394 = arith.mulf %380, %389 : vector<4x256xf32>
    %395 = vector.broadcast %393 : vector<1x256xf32> to vector<4x256xf32>
    %396 = arith.mulf %380, %395 : vector<4x256xf32>
    %397 = arith.addf %394, %396 : vector<4x256xf32>
    %398 = vector.broadcast %383 : vector<1x256xf32> to vector<4x256xf32>
    %399 = arith.mulf %398, %389 : vector<4x256xf32>
    %400 = arith.addf %397, %399 : vector<4x256xf32>
    %401 = arith.mulf %383, %393 : vector<1x256xf32>
    %cst_176 = arith.constant 3.000000e+00 : f32
    %402 = vector.broadcast %cst_176 : f32 to vector<1x256xf32>
    %403 = arith.mulf %402, %401 : vector<1x256xf32>
    %404 = vector.extract_strided_slice %273 {offsets = [7, 0], sizes = [1, 256], strides = [1, 1]} : vector<8x256xf32> to vector<1x256xf32>
    %c7_177 = arith.constant 7 : index
    %c0_178 = arith.constant 0 : index
    %c0_179 = arith.constant 0 : index
    %405 = vector.load %arg5[%c7_177, %c0_178, %c0_179] : memref<8x4x1xf32, #tpu.memory_space<vmem>>, vector<1x4x1xf32>
    %406 = vector.shape_cast %405 : vector<1x4x1xf32> to vector<4x1xf32>
    %407 = vector.broadcast %406 : vector<4x1xf32> to vector<4x256xf32>
    %408 = vector.broadcast %404 : vector<1x256xf32> to vector<4x256xf32>
    %409 = arith.mulf %407, %408 : vector<4x256xf32>
    %cst_180 = arith.constant dense<0.000000e+00> : vector<256xf32>
    %410 = vector.multi_reduction <add>, %409, %cst_180 [0] : vector<4x256xf32> to vector<256xf32>
    %411 = vector.shape_cast %410 : vector<256xf32> to vector<1x256xf32>
    %cst_181 = arith.constant 1.000000e+00 : f32
    %412 = vector.broadcast %cst_181 : f32 to vector<1x256xf32>
    %413 = arith.subf %412, %411 : vector<1x256xf32>
    %414 = arith.mulf %400, %409 : vector<4x256xf32>
    %415 = vector.broadcast %413 : vector<1x256xf32> to vector<4x256xf32>
    %416 = arith.mulf %400, %415 : vector<4x256xf32>
    %417 = arith.addf %414, %416 : vector<4x256xf32>
    %418 = vector.broadcast %403 : vector<1x256xf32> to vector<4x256xf32>
    %419 = arith.mulf %418, %409 : vector<4x256xf32>
    %420 = arith.addf %417, %419 : vector<4x256xf32>
    %421 = arith.mulf %403, %413 : vector<1x256xf32>
    %cst_182 = arith.constant 3.000000e+00 : f32
    %422 = vector.broadcast %cst_182 : f32 to vector<1x256xf32>
    %423 = arith.mulf %422, %421 : vector<1x256xf32>
    %cst_183 = arith.constant dense<0.000000e+00> : vector<256xf32>
    %424 = vector.multi_reduction <add>, %420, %cst_183 [0] : vector<4x256xf32> to vector<256xf32>
    %425 = vector.shape_cast %424 : vector<256xf32> to vector<1x256xf32>
    %426 = arith.addf %425, %423 : vector<1x256xf32>
    %cst_184 = arith.constant 1.000000e+00 : f32
    %427 = vector.broadcast %cst_184 : f32 to vector<1x256xf32>
    %428 = arith.divf %427, %426 : vector<1x256xf32>
    %429 = vector.broadcast %428 : vector<1x256xf32> to vector<4x256xf32>
    %430 = arith.mulf %420, %429 : vector<4x256xf32>
    %c0_185 = arith.constant 0 : index
    %c0_186 = arith.constant 0 : index
    %431 = vector.load %arg6[%c0_185, %c0_186] : memref<5x256xf32, #tpu.memory_space<vmem>>, vector<4x256xf32>
    tpu.vector_store %arg6[%c0_185, %c0_186], %430 {strides = array<i32>} : memref<5x256xf32, #tpu.memory_space<vmem>>, vector<4x256xf32>,
    %432 = arith.mulf %423, %428 : vector<1x256xf32>
    %c4_187 = arith.constant 4 : index
    %c0_188 = arith.constant 0 : index
    %433 = vector.load %arg6[%c4_187, %c0_188] : memref<5x256xf32, #tpu.memory_space<vmem>>, vector<1x256xf32>
    tpu.vector_store %arg6[%c4_187, %c0_188], %432 {strides = array<i32>} : memref<5x256xf32, #tpu.memory_space<vmem>>, vector<1x256xf32>,
    return
  }
  func.func @transform_0(%arg0: i32) -> (i32, i32) {
    %c0_i32 = arith.constant 0 : i32
    %c0_i32_0 = arith.constant 0 : i32
    return %c0_i32, %arg0 : i32, i32
  }
  func.func @transform_1(%arg0: i32) -> (i32, i32, i32) {
    %c0_i32 = arith.constant 0 : i32
    %c0_i32_0 = arith.constant 0 : i32
    %c0_i32_1 = arith.constant 0 : i32
    %c0_i32_2 = arith.constant 0 : i32
    return %c0_i32, %c0_i32_0, %c0_i32_1 : i32, i32, i32
  }
  func.func @transform_2(%arg0: i32) -> (i32, i32) {
    %c0_i32 = arith.constant 0 : i32
    %c0_i32_0 = arith.constant 0 : i32
    %c0_i32_1 = arith.constant 0 : i32
    return %c0_i32, %c0_i32_0 : i32, i32
  }
  func.func @transform_3(%arg0: i32) -> (i32, i32) {
    %c0_i32 = arith.constant 0 : i32
    %c0_i32_0 = arith.constant 0 : i32
    %c0_i32_1 = arith.constant 0 : i32
    return %c0_i32, %c0_i32_0 : i32, i32
  }
  func.func @transform_4(%arg0: i32) -> (i32, i32, i32) {
    %c0_i32 = arith.constant 0 : i32
    %c0_i32_0 = arith.constant 0 : i32
    %c0_i32_1 = arith.constant 0 : i32
    %c0_i32_2 = arith.constant 0 : i32
    return %c0_i32, %c0_i32_0, %c0_i32_1 : i32, i32, i32
  }
  func.func @transform_5(%arg0: i32) -> (i32, i32) {
    %c0_i32 = arith.constant 0 : i32
    %c0_i32_0 = arith.constant 0 : i32
    return %c0_i32, %arg0 : i32, i32
  }
}

</mosaic_0001>

<bundles_post_ra>
// kernel: _dst_head.1
= control target key start
LH: loop header
LB: loop body
LE: loop exit
PB: predicated region body
PF: predicated region fallthrough
CT: control target
= control target key end

     0   :  { %v1428_v2 = vmov 0   ;;  %s1892_s0 = inlined_call_operand.vmem [shape: f32[32,256], index: 0, kind: input, shape index: {}]   ;;  %s1893_s1 = inlined_call_operand.vmem [shape: f32[32,8,1], index: 1, kind: input, shape index: {}]   ;;  %s1894_s2 = inlined_call_operand.vmem [shape: f32[8,1], index: 2, kind: input, shape index: {}]   ;;  %s1895_s3 = inlined_call_operand.vmem [shape: f32[8,1], index: 3, kind: input, shape index: {}]   ;;  %s1896_s4 = inlined_call_operand.vmem [shape: f32[8,4,1], index: 4, kind: input, shape index: {}]   ;;  %s1897_s5 = inlined_call_operand.hbm [shape: f32[5,256], index: 5, kind: output, shape index: {}]  }
   0x1   :  { %v1322_v0 = vld [vmem:[%s1893_s1 + $0x10] sm:$0xff]  ;;  %v21_v1 = vld [vmem:[%s1893_s1] sm:$0xff]  ;;  %1393 = vset.pattern.permute.xlu1 %v1428_v2  ;;  %1392 = vset.pattern.permute.xlu0 %v1428_v2  ;;  %v1324_v3 = vld [vmem:[%s1893_s1 + $0x18] sm:$0xff] }
   0x2   :  { %77 = vperm.xlu1 %1393, %v1322_v0   ;;  %25 = vperm.xlu0 %1392, %v21_v1   ;;  %v1320_v4 = vld [vmem:[%s1893_s1 + $0x8] sm:$0xff]  ;;  %v1326_v6 = vld [vmem:[%s1893_s1 + $0x20] sm:$0xff]  ;;  %v1332_v7 = vld [vmem:[%s1893_s1 + $0x38] sm:$0xff] }
   0x3   :  { %v1328_v5 = vld [vmem:[%s1893_s1 + $0x28] sm:$0xff]  ;;  %v1330_v8 = vld [vmem:[%s1893_s1 + $0x30] sm:$0xff]  ;;  %v1334_v10 = vld [vmem:[%s1893_s1 + $0x40] sm:$0xff] }
   0x4   :  { %v1336_v9 = vld [vmem:[%s1893_s1 + $0x48] sm:$0xff]  ;;  %v1340_v11 = vld [vmem:[%s1893_s1 + $0x58] sm:$0xff]  ;;  %v1338_v12 = vld [vmem:[%s1893_s1 + $0x50] sm:$0xff] }
   0x6   :  { %103 = vperm.xlu1 %1393, %v1324_v3   ;;  %51 = vperm.xlu0 %1392, %v1320_v4  }
   0xa   :  { %155 = vperm.xlu1 %1393, %v1328_v5   ;;  %129 = vperm.xlu0 %1392, %v1326_v6  }
   0xe   :  { %207 = vperm.xlu1 %1393, %v1332_v7   ;;  %181 = vperm.xlu0 %1392, %v1330_v8  }
  0x12   :  { %259 = vperm.xlu1 %1393, %v1336_v9   ;;  %233 = vperm.xlu0 %1392, %v1334_v10  }
  0x13   :  { %10 = vsyncpa [#allocation3], 0  ;;  %v1344_v13 = vld [vmem:[%s1893_s1 + $0x68] sm:$0xff]  ;;  %v1342_v14 = vld [vmem:[%s1893_s1 + $0x60] sm:$0xff]  ;;  %v29_v43 = vlaneseq  ;;  %vm909_vm0 = vcmask 1043456  }
  0x14   :  { %v1348_v15 = vld [vmem:[%s1893_s1 + $0x78] sm:$0xff]  ;;  %v1346_v16 = vld [vmem:[%s1893_s1 + $0x70] sm:$0xff]  ;;  %v1352_v17 = vld [vmem:[%s1893_s1 + $0x88] sm:$0xff] }
  0x15   :  { %v1350_v18 = vld [vmem:[%s1893_s1 + $0x80] sm:$0xff]  ;;  %v1356_v19 = vld [vmem:[%s1893_s1 + $0x98] sm:$0xff]  ;;  %v1354_v20 = vld [vmem:[%s1893_s1 + $0x90] sm:$0xff]  ;;  %v1588_v44 = vshrl.u32 %v29_v43, 7  ;;  %vm1301_vm1 = vcmp.lt.s32.totalorder %v29_v43, 256 }
  0x16   :  { %311 = vperm.xlu1 %1393, %v1340_v11   ;;  %285 = vperm.xlu0 %1392, %v1338_v12   ;;  %v1360_v21 = vld [vmem:[%s1893_s1 + $0xa8] sm:$0xff]  ;;  %v1358_v22 = vld [vmem:[%s1893_s1 + $0xa0] sm:$0xff]  ;;  %v1364_v23 = vld [vmem:[%s1893_s1 + $0xb8] sm:$0xff] }
  0x17   :  { %v1362_v24 = vld [vmem:[%s1893_s1 + $0xb0] sm:$0xff]  ;;  %v1368_v25 = vld [vmem:[%s1893_s1 + $0xc8] sm:$0xff]  ;;  %v1366_v26 = vld [vmem:[%s1893_s1 + $0xc0] sm:$0xff]  ;;  %v1591_v45 = vsub.s32 0, %v1588_v44  ;;  %v1594_v46 = vsub.s32 1, %v1588_v44 }
  0x18   :  { %v1372_v27 = vld [vmem:[%s1893_s1 + $0xd8] sm:$0xff]  ;;  %v1370_v28 = vld [vmem:[%s1893_s1 + $0xd0] sm:$0xff]  ;;  %v1376_v29 = vld [vmem:[%s1893_s1 + $0xe8] sm:$0xff] }
  0x19   :  { %v1374_v30 = vld [vmem:[%s1893_s1 + $0xe0] sm:$0xff]  ;;  %v1380_v31 = vld [vmem:[%s1893_s1 + $0xf8] sm:$0xff]  ;;  %v1378_v32 = vld [vmem:[%s1893_s1 + $0xf0] sm:$0xff] }
  0x1a   :  { %363 = vperm.xlu1 %1393, %v1344_v13   ;;  %337 = vperm.xlu0 %1392, %v1342_v14   ;;  %v865_v33 = vld [vmem:[%s1895_s3] sm:$0xff]  ;;  %v1384_v37 = vld [vmem:[%s1896_s4 + $0xc] sm:$0xf]  ;;  %v1383_v38 = vld [vmem:[%s1896_s4 + $0x8] sm:$0xf] }
  0x1b   :  { %v851_v34 = vld [vmem:[%s1894_s2] sm:$0xff]  ;;  %v1386_v39 = vld [vmem:[%s1896_s4 + $0x14] sm:$0xf]  ;;  %v1385_v40 = vld [vmem:[%s1896_s4 + $0x10] sm:$0xf] }
  0x1c   :  { %v893_v35 = vld [vmem:[%s1896_s4] sm:$0xf]  ;;  %v1382_v36 = vld [vmem:[%s1896_s4 + $0x4] sm:$0xf]  ;;  %v1388_v41 = vld [vmem:[%s1896_s4 + $0x1c] sm:$0xf] }
  0x1d   :  { %v1387_v42 = vld [vmem:[%s1896_s4 + $0x18] sm:$0xf]  ;;  %v22_v47 = vld [vmem:[%s1892_s0] ss:$8 sm:$0x3] }
  0x1e   :  { %415 = vperm.xlu1 %1393, %v1348_v15   ;;  %389 = vperm.xlu0 %1392, %v1346_v16   ;;  %v1323_v48 = vld [vmem:[%s1892_s0 + $0x2] ss:$8 sm:$0x3]  ;;  %v32_v49 = vrot.slane %v22_v47, %v1591_v45  ;;  %v36_v50 = vrot.slane %v22_v47, %v1594_v46  ;;  %v1321_v51 = vld [vmem:[%s1892_s0 + $0x1] ss:$8 sm:$0x3] }
  0x1f   :  { %v1325_v54 = vld [vmem:[%s1892_s0 + $0x3] ss:$8 sm:$0x3]  ;;  %v84_v55 = vrot.slane %v1323_v48, %v1591_v45  ;;  %v88_v56 = vrot.slane %v1323_v48, %v1594_v46  ;;  %v58_v57 = vrot.slane %v1321_v51, %v1591_v45  ;;  %v62_v58 = vrot.slane %v1321_v51, %v1594_v46  ;;  %v1329_v59 = vld [vmem:[%s1892_s0 + $0x5] ss:$8 sm:$0x3] }
  0x20   :  { %v110_v62 = vrot.slane %v1325_v54, %v1591_v45  ;;  %v114_v63 = vrot.slane %v1325_v54, %v1594_v46  ;;  %v1327_v0 = vld [vmem:[%s1892_s0 + $0x4] ss:$8 sm:$0x3]  ;;  %v162_v3 = vrot.slane %v1329_v59, %v1591_v45  ;;  %v166_v4 = vrot.slane %v1329_v59, %v1594_v46  ;;  %v1333_v9 = vld [vmem:[%s1892_s0 + $0x7] ss:$8 sm:$0x3] }
  0x21   :  { %v1331_v10 = vld [vmem:[%s1892_s0 + $0x6] ss:$8 sm:$0x3]  ;;  %v136_v13 = vrot.slane %v1327_v0, %v1591_v45  ;;  %v140_v14 = vrot.slane %v1327_v0, %v1594_v46  ;;  %v1339_v54 = vld [vmem:[%s1892_s0 + $0x12] ss:$8 sm:$0x3] }
  0x22   :  { %467 = vperm.xlu1 %1393, %v1352_v17   ;;  %441 = vperm.xlu0 %1392, %v1350_v18  }
  0x26   :  { %519 = vperm.xlu1 %1393, %v1356_v19   ;;  %493 = vperm.xlu0 %1392, %v1354_v20  }
  0x2a   :  { %571 = vperm.xlu1 %1393, %v1360_v21   ;;  %545 = vperm.xlu0 %1392, %v1358_v22   ;;  %v214_v21 = vrot.slane %v1333_v9, %v1591_v45  ;;  %v218_v22 = vrot.slane %v1333_v9, %v1594_v46  ;;  %v1345_v9 = vld [vmem:[%s1892_s0 + $0x15] ss:$8 sm:$0x3] }
  0x2e   :  { %623 = vperm.xlu1 %1393, %v1364_v23   ;;  %597 = vperm.xlu0 %1392, %v1362_v24   ;;  %v188_v23 = vrot.slane %v1331_v10, %v1591_v45  ;;  %v192_v24 = vrot.slane %v1331_v10, %v1594_v46  ;;  %v1343_v10 = vld [vmem:[%s1892_s0 + $0x14] ss:$8 sm:$0x3] }
  0x32   :  { %675 = vperm.xlu1 %1393, %v1368_v25   ;;  %649 = vperm.xlu0 %1392, %v1366_v26  }
  0x36   :  { %727 = vperm.xlu1 %1393, %v1372_v27   ;;  %701 = vperm.xlu0 %1392, %v1370_v28  }
  0x3a   :  { %779 = vperm.xlu1 %1393, %v1376_v29   ;;  %753 = vperm.xlu0 %1392, %v1374_v30   ;;  %v1337_v29 = vld [vmem:[%s1892_s0 + $0x11] ss:$8 sm:$0x3]  ;;  %v1335_v30 = vld [vmem:[%s1892_s0 + $0x10] ss:$8 sm:$0x3] }
  0x3b   :  { %v240_v47 = vrot.slane %v1335_v30, %v1591_v45  ;;  %v244_v48 = vrot.slane %v1335_v30, %v1594_v46  ;;  %v1347_v30 = vld [vmem:[%s1892_s0 + $0x16] ss:$8 sm:$0x3] }
  0x3e   :  { %831 = vperm.xlu1 %1393, %v1380_v31   ;;  %805 = vperm.xlu0 %1392, %v1378_v32  }
  0x42   :  { %868 = vperm.xlu1 %1393, %v865_v33   ;;  %854 = vperm.xlu0 %1392, %v851_v34  }
  0x46   :  { %896 = vperm.xlu1 %1393, %v893_v35   ;;  %930 = vperm.xlu0 %1392, %v1382_v36  }
  0x4a   :  { %1024 = vperm.xlu1 %1393, %v1384_v37   ;;  %977 = vperm.xlu0 %1392, %v1383_v38  }
  0x4e   :  { %1118 = vperm.xlu1 %1393, %v1386_v39   ;;  %1071 = vperm.xlu0 %1392, %v1385_v40  }
  0x52   :  { %1212 = vperm.xlu1 %1393, %v1388_v41   ;;  %1165 = vperm.xlu0 %1392, %v1387_v42   ;;  %v266_v41 = vrot.slane %v1337_v29, %v1591_v45  ;;  %v270_v42 = vrot.slane %v1337_v29, %v1594_v46  ;;  %v1349_v29 = vld [vmem:[%s1892_s0 + $0x17] ss:$8 sm:$0x3] }
  0x7d   :  { %v78_v52 = vpop.permute.xlu1 %77  ;;  %v26_v53 = vpop.permute.xlu0 %25 }
  0x7e   :  { %v39_v60 = vsub.f32 %v26_v53, %v32_v49  ;;  %v40_v61 = vsub.f32 %v26_v53, %v36_v50  ;;  %v91_v5 = vsub.f32 %v78_v52, %v84_v55  ;;  %v92_v6 = vsub.f32 %v78_v52, %v88_v56  ;;  %v1341_v53 = vld [vmem:[%s1892_s0 + $0x13] ss:$8 sm:$0x3] }
  0x80   :  { %v41_v11 = vmul.f32 %v39_v60, %v39_v60  ;;  %v42_v12 = vmul.f32 %v40_v61, %v40_v61  ;;  %v93_v25 = vmul.f32 %v91_v5, %v91_v5  ;;  %v94_v26 = vmul.f32 %v92_v6, %v92_v6 }
  0x81   :  { %v104_v1 = vpop.permute.xlu1 %103  ;;  %v52_v2 = vpop.permute.xlu0 %51 }
  0x82   :  { %v65_v7 = vsub.f32 %v52_v2, %v58_v57  ;;  %v66_v8 = vsub.f32 %v52_v2, %v62_v58  ;;  %v117_v15 = vsub.f32 %v104_v1, %v110_v62  ;;  %v118_v16 = vsub.f32 %v104_v1, %v114_v63 }
  0x83   :  { %v318_v1 = vrot.slane %v1341_v53, %v1591_v45  ;;  %v322_v2 = vrot.slane %v1341_v53, %v1594_v46  ;;  %v1353_v53 = vld [vmem:[%s1892_s0 + $0x21] ss:$8 sm:$0x3] }
  0x84   :  { %v67_v17 = vmul.f32 %v65_v7, %v65_v7  ;;  %v68_v18 = vmul.f32 %v66_v8, %v66_v8  ;;  %v119_v35 = vmul.f32 %v117_v15, %v117_v15  ;;  %v120_v36 = vmul.f32 %v118_v16, %v118_v16 }
  0x85   :  { %v156_v19 = vpop.permute.xlu1 %155  ;;  %v130_v20 = vpop.permute.xlu0 %129 }
  0x86   :  { %v69_v27 = vadd.f32 %v67_v17, %v41_v11  ;;  %v70_v28 = vadd.f32 %v68_v18, %v42_v12  ;;  %v169_v31 = vsub.f32 %v156_v19, %v162_v3  ;;  %v170_v32 = vsub.f32 %v156_v19, %v166_v4 }
  0x87   :  { %v143_v33 = vsub.f32 %v130_v20, %v136_v13  ;;  %v144_v34 = vsub.f32 %v130_v20, %v140_v14  ;;  %v292_v3 = vrot.slane %v1339_v54, %v1591_v45  ;;  %v296_v4 = vrot.slane %v1339_v54, %v1594_v46  ;;  %v1351_v54 = vld [vmem:[%s1892_s0 + $0x20] ss:$8 sm:$0x3] }
  0x88   :  { %v95_v37 = vadd.f32 %v93_v25, %v69_v27  ;;  %v96_v38 = vadd.f32 %v94_v26, %v70_v28  ;;  %v171_v55 = vmul.f32 %v169_v31, %v169_v31  ;;  %v172_v56 = vmul.f32 %v170_v32, %v170_v32 }
  0x89   :  { %v208_v39 = vpop.permute.xlu1 %207  ;;  %v182_v40 = vpop.permute.xlu0 %181  ;;  %v145_v51 = vmul.f32 %v143_v33, %v143_v33  ;;  %v146_v52 = vmul.f32 %v144_v34, %v144_v34 }
  0x8a   :  { %v121_v49 = vadd.f32 %v119_v35, %v95_v37  ;;  %v122_v50 = vadd.f32 %v120_v36, %v96_v38  ;;  %v195_v57 = vsub.f32 %v182_v40, %v188_v23  ;;  %v196_v58 = vsub.f32 %v182_v40, %v192_v24 }
  0x8b   :  { %v221_v61 = vsub.f32 %v208_v39, %v214_v21  ;;  %v222_v62 = vsub.f32 %v208_v39, %v218_v22  ;;  %v370_v21 = vrot.slane %v1345_v9, %v1591_v45  ;;  %v374_v22 = vrot.slane %v1345_v9, %v1594_v46  ;;  %v1357_v9 = vld [vmem:[%s1892_s0 + $0x23] ss:$8 sm:$0x3] }
  0x8c   :  { %v147_v59 = vadd.f32 %v145_v51, %v121_v49  ;;  %v148_v60 = vadd.f32 %v146_v52, %v122_v50  ;;  %v197_v7 = vmul.f32 %v195_v57, %v195_v57  ;;  %v198_v8 = vmul.f32 %v196_v58, %v196_v58 }
  0x8d   :  { %v260_v63 = vpop.permute.xlu1 %259  ;;  %v234_v0 = vpop.permute.xlu0 %233  ;;  %v223_v15 = vmul.f32 %v221_v61, %v221_v61  ;;  %v224_v16 = vmul.f32 %v222_v62, %v222_v62  ;;  %v344_v23 = vrot.slane %v1343_v10, %v1591_v45  ;;  %v348_v24 = vrot.slane %v1343_v10, %v1594_v46  ;;  %v1355_v10 = vld [vmem:[%s1892_s0 + $0x22] ss:$8 sm:$0x3] }
  0x8e   :  { %v173_v5 = vadd.f32 %v171_v55, %v147_v59  ;;  %v174_v6 = vadd.f32 %v172_v56, %v148_v60  ;;  %v273_v11 = vsub.f32 %v260_v63, %v266_v41  ;;  %v274_v12 = vsub.f32 %v260_v63, %v270_v42 }
  0x8f   :  { %v247_v13 = vsub.f32 %v234_v0, %v240_v47  ;;  %v248_v14 = vsub.f32 %v234_v0, %v244_v48  ;;  %v422_v41 = vrot.slane %v1349_v29, %v1591_v45  ;;  %v426_v42 = vrot.slane %v1349_v29, %v1594_v46  ;;  %v1361_v29 = vld [vmem:[%s1892_s0 + $0x25] ss:$8 sm:$0x3] }
  0x90   :  { %v199_v17 = vadd.f32 %v197_v7, %v173_v5  ;;  %v200_v18 = vadd.f32 %v198_v8, %v174_v6  ;;  %v275_v31 = vmul.f32 %v273_v11, %v273_v11  ;;  %v276_v32 = vmul.f32 %v274_v12, %v274_v12 }
  0x91   :  { %v312_v19 = vpop.permute.xlu1 %311  ;;  %v286_v20 = vpop.permute.xlu0 %285  ;;  %v249_v27 = vmul.f32 %v247_v13, %v247_v13  ;;  %v250_v28 = vmul.f32 %v248_v14, %v248_v14  ;;  %v396_v47 = vrot.slane %v1347_v30, %v1591_v45  ;;  %v400_v48 = vrot.slane %v1347_v30, %v1594_v46  ;;  %v1359_v30 = vld [vmem:[%s1892_s0 + $0x24] ss:$8 sm:$0x3] }
  0x92   :  { %v225_v25 = vadd.f32 %v223_v15, %v199_v17  ;;  %v226_v26 = vadd.f32 %v224_v16, %v200_v18  ;;  %v299_v33 = vsub.f32 %v286_v20, %v292_v3  ;;  %v300_v34 = vsub.f32 %v286_v20, %v296_v4 }
  0x93   :  { %v325_v37 = vsub.f32 %v312_v19, %v318_v1  ;;  %v326_v38 = vsub.f32 %v312_v19, %v322_v2  ;;  %v474_v1 = vrot.slane %v1353_v53, %v1591_v45  ;;  %v478_v2 = vrot.slane %v1353_v53, %v1594_v46  ;;  %v1365_v53 = vld [vmem:[%s1892_s0 + $0x27] ss:$8 sm:$0x3] }
  0x94   :  { %v251_v35 = vadd.f32 %v249_v27, %v225_v25  ;;  %v252_v36 = vadd.f32 %v250_v28, %v226_v26  ;;  %v301_v51 = vmul.f32 %v299_v33, %v299_v33  ;;  %v302_v52 = vmul.f32 %v300_v34, %v300_v34 }
  0x95   :  { %v364_v39 = vpop.permute.xlu1 %363  ;;  %v338_v40 = vpop.permute.xlu0 %337  ;;  %v327_v59 = vmul.f32 %v325_v37, %v325_v37  ;;  %v328_v60 = vmul.f32 %v326_v38, %v326_v38  ;;  %v448_v3 = vrot.slane %v1351_v54, %v1591_v45  ;;  %v452_v4 = vrot.slane %v1351_v54, %v1594_v46  ;;  %v1363_v54 = vld [vmem:[%s1892_s0 + $0x26] ss:$8 sm:$0x3] }
  0x96   :  { %v277_v49 = vadd.f32 %v275_v31, %v251_v35  ;;  %v278_v50 = vadd.f32 %v276_v32, %v252_v36  ;;  %v377_v55 = vsub.f32 %v364_v39, %v370_v21  ;;  %v378_v56 = vsub.f32 %v364_v39, %v374_v22 }
  0x97   :  { %v351_v57 = vsub.f32 %v338_v40, %v344_v23  ;;  %v352_v58 = vsub.f32 %v338_v40, %v348_v24  ;;  %v526_v21 = vrot.slane %v1357_v9, %v1591_v45  ;;  %v530_v22 = vrot.slane %v1357_v9, %v1594_v46  ;;  %v1369_v9 = vld [vmem:[%s1892_s0 + $0x31] ss:$8 sm:$0x3] }
  0x98   :  { %v303_v61 = vadd.f32 %v301_v51, %v277_v49  ;;  %v304_v62 = vadd.f32 %v302_v52, %v278_v50  ;;  %v379_v11 = vmul.f32 %v377_v55, %v377_v55  ;;  %v380_v12 = vmul.f32 %v378_v56, %v378_v56 }
  0x99   :  { %v416_v63 = vpop.permute.xlu1 %415  ;;  %v390_v0 = vpop.permute.xlu0 %389  ;;  %v353_v7 = vmul.f32 %v351_v57, %v351_v57  ;;  %v354_v8 = vmul.f32 %v352_v58, %v352_v58  ;;  %v500_v23 = vrot.slane %v1355_v10, %v1591_v45  ;;  %v504_v24 = vrot.slane %v1355_v10, %v1594_v46  ;;  %v1367_v10 = vld [vmem:[%s1892_s0 + $0x30] ss:$8 sm:$0x3] }
  0x9a   :  { %v329_v5 = vadd.f32 %v327_v59, %v303_v61  ;;  %v330_v6 = vadd.f32 %v328_v60, %v304_v62  ;;  %v403_v13 = vsub.f32 %v390_v0, %v396_v47  ;;  %v404_v14 = vsub.f32 %v390_v0, %v400_v48 }
  0x9b   :  { %v429_v17 = vsub.f32 %v416_v63, %v422_v41  ;;  %v430_v18 = vsub.f32 %v416_v63, %v426_v42  ;;  %v578_v41 = vrot.slane %v1361_v29, %v1591_v45  ;;  %v582_v42 = vrot.slane %v1361_v29, %v1594_v46  ;;  %v1373_v29 = vld [vmem:[%s1892_s0 + $0x33] ss:$8 sm:$0x3] }
  0x9c   :  { %v355_v15 = vadd.f32 %v353_v7, %v329_v5  ;;  %v356_v16 = vadd.f32 %v354_v8, %v330_v6  ;;  %v405_v27 = vmul.f32 %v403_v13, %v403_v13  ;;  %v406_v28 = vmul.f32 %v404_v14, %v404_v14 }
  0x9d   :  { %v468_v19 = vpop.permute.xlu1 %467  ;;  %v442_v20 = vpop.permute.xlu0 %441  ;;  %v431_v35 = vmul.f32 %v429_v17, %v429_v17  ;;  %v432_v36 = vmul.f32 %v430_v18, %v430_v18  ;;  %v552_v47 = vrot.slane %v1359_v30, %v1591_v45  ;;  %v556_v48 = vrot.slane %v1359_v30, %v1594_v46  ;;  %v1371_v30 = vld [vmem:[%s1892_s0 + $0x32] ss:$8 sm:$0x3] }
  0x9e   :  { %v381_v25 = vadd.f32 %v379_v11, %v355_v15  ;;  %v382_v26 = vadd.f32 %v380_v12, %v356_v16  ;;  %v481_v31 = vsub.f32 %v468_v19, %v474_v1  ;;  %v482_v32 = vsub.f32 %v468_v19, %v478_v2 }
  0x9f   :  { %v455_v33 = vsub.f32 %v442_v20, %v448_v3  ;;  %v456_v34 = vsub.f32 %v442_v20, %v452_v4  ;;  %v630_v1 = vrot.slane %v1365_v53, %v1591_v45  ;;  %v634_v2 = vrot.slane %v1365_v53, %v1594_v46  ;;  %v1377_v53 = vld [vmem:[%s1892_s0 + $0x35] ss:$8 sm:$0x3] }
  0xa0   :  { %v407_v37 = vadd.f32 %v405_v27, %v381_v25  ;;  %v408_v38 = vadd.f32 %v406_v28, %v382_v26  ;;  %v483_v55 = vmul.f32 %v481_v31, %v481_v31  ;;  %v484_v56 = vmul.f32 %v482_v32, %v482_v32 }
  0xa1   :  { %v520_v39 = vpop.permute.xlu1 %519  ;;  %v494_v40 = vpop.permute.xlu0 %493  ;;  %v457_v51 = vmul.f32 %v455_v33, %v455_v33  ;;  %v458_v52 = vmul.f32 %v456_v34, %v456_v34  ;;  %v604_v3 = vrot.slane %v1363_v54, %v1591_v45  ;;  %v608_v4 = vrot.slane %v1363_v54, %v1594_v46  ;;  %v1375_v54 = vld [vmem:[%s1892_s0 + $0x34] ss:$8 sm:$0x3] }
  0xa2   :  { %v433_v49 = vadd.f32 %v431_v35, %v407_v37  ;;  %v434_v50 = vadd.f32 %v432_v36, %v408_v38  ;;  %v507_v57 = vsub.f32 %v494_v40, %v500_v23  ;;  %v508_v58 = vsub.f32 %v494_v40, %v504_v24 }
  0xa3   :  { %v533_v61 = vsub.f32 %v520_v39, %v526_v21  ;;  %v534_v62 = vsub.f32 %v520_v39, %v530_v22  ;;  %v682_v21 = vrot.slane %v1369_v9, %v1591_v45  ;;  %v686_v22 = vrot.slane %v1369_v9, %v1594_v46  ;;  %v1381_v9 = vld [vmem:[%s1892_s0 + $0x37] ss:$8 sm:$0x3] }
  0xa4   :  { %v459_v59 = vadd.f32 %v457_v51, %v433_v49  ;;  %v460_v60 = vadd.f32 %v458_v52, %v434_v50  ;;  %v509_v7 = vmul.f32 %v507_v57, %v507_v57  ;;  %v510_v8 = vmul.f32 %v508_v58, %v508_v58 }
  0xa5   :  { %v572_v63 = vpop.permute.xlu1 %571  ;;  %v546_v0 = vpop.permute.xlu0 %545  ;;  %v535_v15 = vmul.f32 %v533_v61, %v533_v61  ;;  %v536_v16 = vmul.f32 %v534_v62, %v534_v62  ;;  %v656_v23 = vrot.slane %v1367_v10, %v1591_v45  ;;  %v660_v24 = vrot.slane %v1367_v10, %v1594_v46  ;;  %v1379_v10 = vld [vmem:[%s1892_s0 + $0x36] ss:$8 sm:$0x3]  ;;  %s1430_s0 = smov [#allocation2]  }
  0xa6   :  { %v485_v5 = vadd.f32 %v483_v55, %v459_v59  ;;  %v486_v6 = vadd.f32 %v484_v56, %v460_v60  ;;  %v585_v11 = vsub.f32 %v572_v63, %v578_v41  ;;  %v586_v12 = vsub.f32 %v572_v63, %v582_v42  ;;  %s1312_s29 = sshll.u32 %s1430_s0, 4  ;;  %s1313_s29 = int_to_ptr.vmem [resolvable:$true] %s1312_s29 }
  0xa7   :  { %v559_v13 = vsub.f32 %v546_v0, %v552_v47  ;;  %v560_v14 = vsub.f32 %v546_v0, %v556_v48  ;;  %v734_v41 = vrot.slane %v1373_v29, %v1591_v45  ;;  %v738_v42 = vrot.slane %v1373_v29, %v1594_v46  ;;  %s1406_s30 = scalar_lea.vmem %s1313_s29, 256  ;;  %p1411_p1 = scmp.lt.s32.totalorder %s1313_s29, %s1313_s29 }
  0xa8   :  { %v511_v17 = vadd.f32 %v509_v7, %v485_v5  ;;  %v512_v18 = vadd.f32 %v510_v8, %v486_v6  ;;  %v587_v31 = vmul.f32 %v585_v11, %v585_v11  ;;  %v588_v32 = vmul.f32 %v586_v12, %v586_v12  ;;  %p1407_p0 = scmp.ne.s32.totalorder %s1313_s29, %s1406_s30  ;;  %p1412_p2 = scmp.lt.s32.totalorder %s1406_s30, %s1406_s30 }
  0xa9   :  { %v624_v19 = vpop.permute.xlu1 %623  ;;  %v598_v20 = vpop.permute.xlu0 %597  ;;  %v561_v27 = vmul.f32 %v559_v13, %v559_v13  ;;  %v562_v28 = vmul.f32 %v560_v14, %v560_v14  ;;  %v708_v47 = vrot.slane %v1371_v30, %v1591_v45  ;;  %v712_v48 = vrot.slane %v1371_v30, %v1594_v46 }
  0xaa   :  { %v537_v25 = vadd.f32 %v535_v15, %v511_v17  ;;  %v538_v26 = vadd.f32 %v536_v16, %v512_v18  ;;  %v611_v33 = vsub.f32 %v598_v20, %v604_v3  ;;  %v612_v34 = vsub.f32 %v598_v20, %v608_v4  ;;  %p1413_p3 = por %p1412_p2, %p1411_p1 }
  0xab   :  { %v637_v37 = vsub.f32 %v624_v19, %v630_v1  ;;  %v638_v38 = vsub.f32 %v624_v19, %v634_v2  ;;  %v786_v1 = vrot.slane %v1377_v53, %v1591_v45  ;;  %v790_v2 = vrot.slane %v1377_v53, %v1594_v46 }
  0xac   :  { %v563_v35 = vadd.f32 %v561_v27, %v537_v25  ;;  %v564_v36 = vadd.f32 %v562_v28, %v538_v26  ;;  %v613_v51 = vmul.f32 %v611_v33, %v611_v33  ;;  %v614_v52 = vmul.f32 %v612_v34, %v612_v34  ;;  %p1414_p4 = pnand %p1413_p3, %p1407_p0 }
  0xad   :  { %v676_v39 = vpop.permute.xlu1 %675  ;;  %v650_v40 = vpop.permute.xlu0 %649  ;;  %v639_v59 = vmul.f32 %v637_v37, %v637_v37  ;;  %v640_v60 = vmul.f32 %v638_v38, %v638_v38  ;;  %v760_v3 = vrot.slane %v1375_v54, %v1591_v45  ;;  %v764_v4 = vrot.slane %v1375_v54, %v1594_v46 }
  0xae   :  { %v589_v49 = vadd.f32 %v587_v31, %v563_v35  ;;  %v590_v50 = vadd.f32 %v588_v32, %v564_v36  ;;  %v689_v55 = vsub.f32 %v676_v39, %v682_v21  ;;  %v690_v56 = vsub.f32 %v676_v39, %v686_v22 }
  0xaf   :  { %v663_v57 = vsub.f32 %v650_v40, %v656_v23  ;;  %v664_v58 = vsub.f32 %v650_v40, %v660_v24  ;;  %v838_v21 = vrot.slane %v1381_v9, %v1591_v45  ;;  %v842_v22 = vrot.slane %v1381_v9, %v1594_v46 }
  0xb0   :  { %v615_v61 = vadd.f32 %v613_v51, %v589_v49  ;;  %v616_v62 = vadd.f32 %v614_v52, %v590_v50  ;;  %v691_v11 = vmul.f32 %v689_v55, %v689_v55  ;;  %v692_v12 = vmul.f32 %v690_v56, %v690_v56 }
  0xb1   :  { %v728_v63 = vpop.permute.xlu1 %727  ;;  %v702_v0 = vpop.permute.xlu0 %701  ;;  %v665_v7 = vmul.f32 %v663_v57, %v663_v57  ;;  %v666_v8 = vmul.f32 %v664_v58, %v664_v58  ;;  %v812_v23 = vrot.slane %v1379_v10, %v1591_v45  ;;  %v816_v24 = vrot.slane %v1379_v10, %v1594_v46 }
  0xb2   :  { %v641_v5 = vadd.f32 %v639_v59, %v615_v61  ;;  %v642_v6 = vadd.f32 %v640_v60, %v616_v62  ;;  %v715_v13 = vsub.f32 %v702_v0, %v708_v47  ;;  %v716_v14 = vsub.f32 %v702_v0, %v712_v48 }
  0xb3   :  { %v741_v17 = vsub.f32 %v728_v63, %v734_v41  ;;  %v742_v18 = vsub.f32 %v728_v63, %v738_v42 }
  0xb4   :  { %v667_v15 = vadd.f32 %v665_v7, %v641_v5  ;;  %v668_v16 = vadd.f32 %v666_v8, %v642_v6  ;;  %v717_v27 = vmul.f32 %v715_v13, %v715_v13  ;;  %v718_v28 = vmul.f32 %v716_v14, %v716_v14 }
  0xb5   :  { %v780_v19 = vpop.permute.xlu1 %779  ;;  %v754_v20 = vpop.permute.xlu0 %753  ;;  %v743_v33 = vmul.f32 %v741_v17, %v741_v17  ;;  %v744_v34 = vmul.f32 %v742_v18, %v742_v18 }
  0xb6   :  { %v693_v25 = vadd.f32 %v691_v11, %v667_v15  ;;  %v694_v26 = vadd.f32 %v692_v12, %v668_v16  ;;  %v793_v29 = vsub.f32 %v780_v19, %v786_v1  ;;  %v794_v30 = vsub.f32 %v780_v19, %v790_v2 }
  0xb7   :  { %v767_v31 = vsub.f32 %v754_v20, %v760_v3  ;;  %v768_v32 = vsub.f32 %v754_v20, %v764_v4 }
  0xb8   :  { %v719_v35 = vadd.f32 %v717_v27, %v693_v25  ;;  %v720_v36 = vadd.f32 %v718_v28, %v694_v26  ;;  %v795_v47 = vmul.f32 %v793_v29, %v793_v29  ;;  %v796_v48 = vmul.f32 %v794_v30, %v794_v30 }
  0xb9   :  { %v832_v37 = vpop.permute.xlu1 %831  ;;  %v806_v38 = vpop.permute.xlu0 %805  ;;  %v769_v41 = vmul.f32 %v767_v31, %v767_v31  ;;  %v770_v42 = vmul.f32 %v768_v32, %v768_v32  ;;  %v1029_v29 = vsub.s32 3, %v1588_v44  ;;  %v982_v30 = vsub.s32 2, %v1588_v44 }
  0xba   :  { %v745_v39 = vadd.f32 %v743_v33, %v719_v35  ;;  %v746_v40 = vadd.f32 %v744_v34, %v720_v36  ;;  %v819_v49 = vsub.f32 %v806_v38, %v812_v23  ;;  %v820_v50 = vsub.f32 %v806_v38, %v816_v24 }
  0xbb   :  { %v845_v53 = vsub.f32 %v832_v37, %v838_v21  ;;  %v846_v54 = vsub.f32 %v832_v37, %v842_v22 }
  0xbc   :  { %v771_v51 = vadd.f32 %v769_v41, %v745_v39  ;;  %v772_v52 = vadd.f32 %v770_v42, %v746_v40  ;;  %v821_v57 = vmul.f32 %v819_v49, %v819_v49  ;;  %v822_v58 = vmul.f32 %v820_v50, %v820_v50 }
  0xbd   :  { %v847_v59 = vmul.f32 %v845_v53, %v845_v53  ;;  %v848_v60 = vmul.f32 %v846_v54, %v846_v54  ;;  %v855_v1 = vpop.permute.xlu0 %854  ;;  %v869_v9 = vpop.permute.xlu1 %868 }
  0xbe   :  { %v797_v55 = vadd.f32 %v795_v47, %v771_v51  ;;  %v798_v56 = vadd.f32 %v796_v48, %v772_v52 }
  0xc0   :  { %v823_v61 = vadd.f32 %v821_v57, %v797_v55  ;;  %v824_v62 = vadd.f32 %v822_v58, %v798_v56 }
  0xc1   :  { %v897_v27 = vpop.permute.xlu1 %896  ;;  %v931_v28 = vpop.permute.xlu0 %930 }
  0xc2   :  { %v849_v63 = vadd.f32 %v847_v59, %v823_v61  ;;  %v850_v0 = vadd.f32 %v848_v60, %v824_v62 }
  0xc4   :  { %v857_v2 = vmul.f32 %v855_v1, %v849_v63  ;;  %v858_v3 = vmul.f32 %v855_v1, %v850_v0 }
  0xc5   :  { %v1025_v41 = vpop.permute.xlu1 %1024  ;;  %v978_v51 = vpop.permute.xlu0 %977 }
  0xc6   :  { %v859_v4 = vsub.f32 0.0, %v857_v2  ;;  %v860_v5 = vsub.f32 0.0, %v858_v3 }
  0xc8   :  { %v861_v6 = vmul.f32 1.442695, %v859_v4  ;;  %v863_v7 = vmul.f32 1.442695, %v860_v5 }
  0xca   :  { %1394 = vpow2.f32 %v861_v6 }
  0xcb   :  { %1396 = vpow2.f32 %v863_v7 }
  0xd7   :  { %v1395_v8 = vpop.eup %1394 }
  0xd8   :  { %v1397_v10 = vpop.eup %1396  ;;  %v871_v11 = vmul.f32 %v1395_v8, %v869_v9 }
  0xd9   :  { %v872_v12 = vmul.f32 %v1397_v10, %v869_v9 }
  0xda   :  { %v873_v13 = vrot.slane %v871_v11, 4 }
  0xdb   :  { %v879_v14 = vrot.slane %v872_v12, 4 }
  0xdc   :  { %v874_v15 = vmax.f32 %v871_v11, %v873_v13 }
  0xdd   :  { %v880_v16 = vmax.f32 %v872_v12, %v879_v14 }
  0xde   :  { %v875_v17 = vrot.slane %v874_v15, 2 }
  0xdf   :  { %v881_v18 = vrot.slane %v880_v16, 2 }
  0xe0   :  { %v876_v19 = vmax.f32 %v874_v15, %v875_v17 }
  0xe1   :  { %v882_v20 = vmax.f32 %v880_v16, %v881_v18 }
  0xe2   :  { %v877_v21 = vrot.slane %v876_v19, 1 }
  0xe3   :  { %v883_v22 = vrot.slane %v882_v20, 1 }
  0xe4   :  { %v878_v23 = vmax.f32 %v876_v19, %v877_v21 }
  0xe5   :  { %v884_v24 = vmax.f32 %v882_v20, %v883_v22 }
  0xe6   :  { %v885_v25 = vadd.f32 0.0001, %v878_v23 }
  0xe7   :  { %v886_v26 = vadd.f32 0.0001, %v884_v24 }
  0xe8   :  { %1398 = vrcp.f32 %v885_v25 }
  0xe9   :  { %1400 = vrcp.f32 %v886_v26 }
  0xf5   :  { %v1399_v31 = vpop.eup %1398 }
  0xf6   :  { %v1401_v32 = vpop.eup %1400  ;;  %v1758_v33 = vmul.f32 %v1399_v31, %v871_v11 }
  0xf7   :  { %v1760_v34 = vmul.f32 %v1401_v32, %v872_v12 }
  0xf8   :  { %v902_v35 = vrot.slane %v1758_v33, %v1591_v45  ;;  %v936_v36 = vrot.slane %v1758_v33, %v1594_v46  ;;  %v1030_v37 = vrot.slane %v1758_v33, %v1029_v29  ;;  %v983_v38 = vrot.slane %v1758_v33, %v982_v30 }
  0xf9   :  { %v906_v39 = vrot.slane %v1760_v34, %v1591_v45  ;;  %v940_v40 = vrot.slane %v1760_v34, %v1594_v46  ;;  %v1034_v42 = vrot.slane %v1760_v34, %v1029_v29  ;;  %v987_v47 = vrot.slane %v1760_v34, %v982_v30 }
  0xfa   :  { %v1774_v48 = vmul.f32 %v902_v35, %v897_v27  ;;  %v1776_v49 = vmul.f32 %v936_v36, %v931_v28  ;;  %v1778_v50 = vmul.f32 %v1030_v37, %v1025_v41  ;;  %v1786_v54 = vmul.f32 %v983_v38, %v978_v51 }
  0xfb   :  { %v1780_v52 = vmul.f32 %v906_v39, %v897_v27  ;;  %v1782_v53 = vmul.f32 %v940_v40, %v931_v28  ;;  %v1784_v45 = vmul.f32 %v1034_v42, %v1025_v41  ;;  %v1794_v57 = vmul.f32 %v987_v47, %v978_v51 }
  0xfc   :  { %v910_v46 = vsel %vm909_vm0, %v1774_v48, 0.0  ;;  %v943_v55 = vsel %vm909_vm0, %v1776_v49, 0.0  ;;  %v1037_v56 = vsel %vm909_vm0, %v1778_v50, 0.0  ;;  %v990_v4 = vsel %vm909_vm0, %v1786_v54, 0.0 }
  0xfd   :  { %v911_v58 = vrot.slane %v910_v46, 4  ;;  %v917_v59 = vsel %vm909_vm0, %v1780_v52, 0.0  ;;  %v944_v60 = vrot.slane %v943_v55, 4  ;;  %v950_v61 = vsel %vm909_vm0, %v1782_v53, 0.0 }
  0xfe   :  { %v918_v62 = vrot.slane %v917_v59, 4  ;;  %v951_v63 = vrot.slane %v950_v61, 4  ;;  %v1038_v0 = vrot.slane %v1037_v56, 4  ;;  %v1044_v3 = vsel %vm909_vm0, %v1784_v45, 0.0 }
  0xff   :  { %v912_v1 = vadd.f32 %v911_v58, %v910_v46  ;;  %v945_v2 = vadd.f32 %v944_v60, %v943_v55  ;;  %v1045_v8 = vrot.slane %v1044_v3, 4  ;;  %v991_v11 = vrot.slane %v990_v4, 4 }
 0x100   :  { %v919_v5 = vadd.f32 %v918_v62, %v917_v59  ;;  %v952_v6 = vadd.f32 %v951_v63, %v950_v61  ;;  %v1039_v7 = vadd.f32 %v1038_v0, %v1037_v56  ;;  %v997_v12 = vsel %vm909_vm0, %v1794_v57, 0.0 }
 0x101   :  { %v913_v9 = vrot.slane %v912_v1, 2  ;;  %v946_v10 = vrot.slane %v945_v2, 2  ;;  %v1046_v16 = vadd.f32 %v1045_v8, %v1044_v3  ;;  %v992_v19 = vadd.f32 %v991_v11, %v990_v4 }
 0x102   :  { %v920_v13 = vrot.slane %v919_v5, 2  ;;  %v953_v14 = vrot.slane %v952_v6, 2  ;;  %v1040_v15 = vrot.slane %v1039_v7, 2  ;;  %v998_v20 = vrot.slane %v997_v12, 4 }
 0x103   :  { %v914_v17 = vadd.f32 %v913_v9, %v912_v1  ;;  %v947_v18 = vadd.f32 %v946_v10, %v945_v2  ;;  %v1047_v24 = vrot.slane %v1046_v16, 2  ;;  %v993_v27 = vrot.slane %v992_v19, 2 }
 0x104   :  { %v921_v21 = vadd.f32 %v920_v13, %v919_v5  ;;  %v954_v22 = vadd.f32 %v953_v14, %v952_v6  ;;  %v1041_v23 = vadd.f32 %v1040_v15, %v1039_v7  ;;  %v999_v28 = vadd.f32 %v998_v20, %v997_v12 }
 0x105   :  { %v915_v25 = vrot.slane %v914_v17, 1  ;;  %v948_v26 = vrot.slane %v947_v18, 1  ;;  %v1048_v31 = vadd.f32 %v1047_v24, %v1046_v16  ;;  %v994_v36 = vadd.f32 %v993_v27, %v992_v19 }
 0x106   :  { %v922_v29 = vrot.slane %v921_v21, 1  ;;  %v955_v30 = vrot.slane %v954_v22, 1  ;;  %v1000_v37 = vrot.slane %v999_v28, 2  ;;  %v1042_v40 = vrot.slane %v1041_v23, 1 }
 0x107   :  { %v916_v32 = vadd.f32 %v915_v25, %v914_v17  ;;  %v949_v35 = vadd.f32 %v948_v26, %v947_v18  ;;  %v1123_v41 = vsub.s32 5, %v1588_v44  ;;  %v995_v51 = vrot.slane %v994_v36, 1 }
 0x108   :  { %v923_v38 = vadd.f32 %v922_v29, %v921_v21  ;;  %v956_v39 = vadd.f32 %v955_v30, %v954_v22  ;;  %v1001_v46 = vadd.f32 %v1000_v37, %v999_v28  ;;  %v959_v58 = vmul.f32 %v1776_v49, %v1774_v48  ;;  %v1072_v37 = vpop.permute.xlu0 %1071 }
 0x109   :  { %v924_v42 = vsub.f32 1.0, %v916_v32  ;;  %v957_v47 = vsub.f32 1.0, %v949_v35  ;;  %v1076_v59 = vsub.s32 4, %v1588_v44  ;;  %v1049_v61 = vrot.slane %v1048_v31, 1 }
 0x10a   :  { %v925_v55 = vsub.f32 1.0, %v923_v38  ;;  %v958_v56 = vsub.f32 1.0, %v956_v39  ;;  %v996_v63 = vadd.f32 %v995_v51, %v994_v36  ;;  %v960_v0 = vmul.f32 %v1782_v53, %v1780_v52 }
 0x10b   :  { %v961_v60 = vmul.f32 %v957_v47, %v1774_v48  ;;  %v969_v62 = vmul.f32 %v957_v47, %v924_v42  ;;  %v1814_v2 = vadd.f32 %v1042_v40, %v1041_v23  ;;  %v965_v5 = vmul.f32 %v1776_v49, %v924_v42 }
 0x10c   :  { %v962_v1 = vmul.f32 %v958_v56, %v1780_v52  ;;  %v970_v3 = vmul.f32 %v958_v56, %v925_v55  ;;  %v1002_v7 = vrot.slane %v1001_v46, 1  ;;  %v966_v9 = vmul.f32 %v1782_v53, %v925_v55  ;;  %v1119_v52 = vpop.permute.xlu1 %1118 }
 0x10d   :  { %v963_v4 = vadd.f32 %v961_v60, %v959_v58  ;;  %v971_v6 = vmul.f32 3.0, %v969_v62  ;;  %v1124_v48 = vrot.slane %v1758_v33, %v1123_v41  ;;  %v1128_v10 = vrot.slane %v1760_v34, %v1123_v41 }
 0x10e   :  { %v964_v8 = vadd.f32 %v962_v1, %v960_v0  ;;  %v1050_v11 = vadd.f32 %v1049_v61, %v1048_v31  ;;  %v1003_v13 = vadd.f32 %v1002_v7, %v1001_v46  ;;  %v1004_v14 = vsub.f32 1.0, %v996_v63 }
 0x10f   :  { %v967_v12 = vadd.f32 %v965_v5, %v963_v4  ;;  %v972_v16 = vmul.f32 3.0, %v970_v3  ;;  %v1820_v17 = vmul.f32 %v1124_v48, %v1119_v52  ;;  %v1822_v18 = vmul.f32 %v1128_v10, %v1119_v52 }
 0x110   :  { %v968_v15 = vadd.f32 %v966_v9, %v964_v8  ;;  %v1005_v49 = vsub.f32 1.0, %v1003_v13  ;;  %v1012_v53 = vmul.f32 %v1786_v54, %v971_v6  ;;  %v1077_v24 = vrot.slane %v1758_v33, %v1076_v59  ;;  %v1213_v13 = vpop.permute.xlu1 %1212 }
 0x111   :  { %v1006_v19 = vmul.f32 %v1786_v54, %v967_v12  ;;  %v1008_v20 = vmul.f32 %v1004_v14, %v967_v12  ;;  %v1131_v22 = vsel %vm909_vm0, %v1820_v17, 0.0  ;;  %v1138_v23 = vsel %vm909_vm0, %v1822_v18, 0.0 }
 0x112   :  { %v1007_v21 = vmul.f32 %v1794_v57, %v968_v15  ;;  %v1009_v25 = vmul.f32 %v1005_v49, %v968_v15  ;;  %v1016_v27 = vmul.f32 %v1004_v14, %v971_v6  ;;  %v1132_v28 = vrot.slane %v1131_v22, 4 }
 0x113   :  { %v1010_v26 = vadd.f32 %v1008_v20, %v1006_v19  ;;  %v1013_v29 = vmul.f32 %v1794_v57, %v972_v16  ;;  %v1139_v30 = vrot.slane %v1138_v23, 4  ;;  %v1081_v31 = vrot.slane %v1760_v34, %v1076_v59 }
 0x114   :  { %v1011_v54 = vadd.f32 %v1009_v25, %v1007_v21  ;;  %v1017_v35 = vmul.f32 %v1005_v49, %v972_v16  ;;  %v1133_v36 = vadd.f32 %v1132_v28, %v1131_v22  ;;  %v1051_v38 = vsub.f32 1.0, %v1814_v2 }
 0x115   :  { %v1014_v32 = vadd.f32 %v1012_v53, %v1010_v26  ;;  %v1835_v39 = vmul.f32 %v1077_v24, %v1072_v37  ;;  %v1837_v40 = vmul.f32 %v1081_v31, %v1072_v37  ;;  %v1052_v41 = vsub.f32 1.0, %v1050_v11  ;;  %v1166_v53 = vpop.permute.xlu0 %1165 }
 0x116   :  { %v1015_v42 = vadd.f32 %v1013_v29, %v1011_v54  ;;  %v1140_v47 = vadd.f32 %v1139_v30, %v1138_v23  ;;  %v1018_v51 = vmul.f32 3.0, %v1016_v27  ;;  %v1134_v55 = vrot.slane %v1133_v36, 2 }
 0x117   :  { %v1053_v57 = vmul.f32 %v1778_v50, %v1014_v32  ;;  %v1055_v46 = vmul.f32 %v1051_v38, %v1014_v32  ;;  %v1084_v56 = vsel %vm909_vm0, %v1835_v39, 0.0  ;;  %v1019_v58 = vmul.f32 3.0, %v1017_v35 }
 0x118   :  { %v1217_v59 = vsub.s32 7, %v1588_v44  ;;  %v1054_v60 = vmul.f32 %v1784_v45, %v1015_v42  ;;  %v1056_v61 = vmul.f32 %v1052_v41, %v1015_v42  ;;  %v1085_v62 = vrot.slane %v1084_v56, 4 }
 0x119   :  { %v1091_v63 = vsel %vm909_vm0, %v1837_v40, 0.0  ;;  %v1141_v0 = vrot.slane %v1140_v47, 2  ;;  %v1170_v2 = vsub.s32 6, %v1588_v44  ;;  %v1135_v3 = vadd.f32 %v1134_v55, %v1133_v36 }
 0x11a   :  { %v1092_v1 = vrot.slane %v1091_v63, 4  ;;  %v1057_v4 = vadd.f32 %v1055_v46, %v1053_v57  ;;  %v1059_v5 = vmul.f32 %v1778_v50, %v1018_v51  ;;  %v1086_v6 = vadd.f32 %v1085_v62, %v1084_v56 }
 0x11b   :  { %v1060_v7 = vmul.f32 %v1784_v45, %v1019_v58  ;;  %v1063_v8 = vmul.f32 %v1051_v38, %v1018_v51  ;;  %v1218_v48 = vrot.slane %v1758_v33, %v1217_v59  ;;  %v1058_v10 = vadd.f32 %v1056_v61, %v1054_v60 }
 0x11c   :  { %v1093_v9 = vadd.f32 %v1092_v1, %v1091_v63  ;;  %v1064_v11 = vmul.f32 %v1052_v41, %v1019_v58  ;;  %v1087_v12 = vrot.slane %v1086_v6, 2  ;;  %v1222_v14 = vrot.slane %v1760_v34, %v1217_v59 }
 0x11d   :  { %v1142_v52 = vadd.f32 %v1141_v0, %v1140_v47  ;;  %v1851_v16 = vmul.f32 %v1218_v48, %v1213_v13  ;;  %v1171_v49 = vrot.slane %v1758_v33, %v1170_v2  ;;  %v1136_v50 = vrot.slane %v1135_v3, 1 }
 0x11e   :  { %v1094_v15 = vrot.slane %v1093_v9, 2  ;;  %v1061_v19 = vadd.f32 %v1059_v5, %v1057_v4  ;;  %v1088_v20 = vadd.f32 %v1087_v12, %v1086_v6  ;;  %v1854_v45 = vmul.f32 %v1222_v14, %v1213_v13 }
 0x11f   :  { %v1225_v22 = vsel %vm909_vm0, %v1851_v16, 0.0  ;;  %v1175_v23 = vrot.slane %v1760_v34, %v1170_v2  ;;  %v1859_v24 = vmul.f32 %v1171_v49, %v1166_v53  ;;  %v1062_v25 = vadd.f32 %v1060_v7, %v1058_v10 }
 0x120   :  { %v1095_v21 = vadd.f32 %v1094_v15, %v1093_v9  ;;  %v1089_v26 = vrot.slane %v1088_v20, 1  ;;  %v1226_v27 = vrot.slane %v1225_v22, 4  ;;  %v1232_v33 = vsel %vm909_vm0, %v1854_v45, 0.0 }
 0x121   :  { %v1233_v29 = vrot.slane %v1232_v33, 4  ;;  %v1863_v30 = vmul.f32 %v1175_v23, %v1166_v53  ;;  %v1178_v31 = vsel %vm909_vm0, %v1859_v24, 0.0  ;;  %v1143_v54 = vrot.slane %v1142_v52, 1 }
 0x122   :  { %v1096_v28 = vrot.slane %v1095_v21, 1  ;;  %v1065_v32 = vmul.f32 3.0, %v1063_v8  ;;  %v1090_v35 = vadd.f32 %v1089_v26, %v1088_v20  ;;  %v1179_v36 = vrot.slane %v1178_v31, 4 }
 0x123   :  { %v1066_v34 = vmul.f32 3.0, %v1064_v11  ;;  %v1227_v38 = vadd.f32 %v1226_v27, %v1225_v22  ;;  %v1185_v41 = vsel %vm909_vm0, %v1863_v30, 0.0  ;;  %v1100_v47 = vmul.f32 %v1835_v39, %v1061_v19 }
 0x124   :  { %v1097_v37 = vadd.f32 %v1096_v28, %v1095_v21  ;;  %v1098_v42 = vsub.f32 1.0, %v1090_v35  ;;  %v1180_v51 = vadd.f32 %v1179_v36, %v1178_v31  ;;  %v1186_v57 = vrot.slane %v1185_v41, 4 }
 0x125   :  { %v1101_v55 = vmul.f32 %v1837_v40, %v1062_v25  ;;  %v1234_v56 = vadd.f32 %v1233_v29, %v1232_v33  ;;  %v1137_v58 = vadd.f32 %v1136_v50, %v1135_v3  ;;  %v1144_v61 = vadd.f32 %v1143_v54, %v1142_v52 }
 0x126   :  { %v1099_v46 = vsub.f32 1.0, %v1097_v37  ;;  %v1102_v59 = vmul.f32 %v1098_v42, %v1061_v19  ;;  %v1110_v60 = vmul.f32 %v1098_v42, %v1065_v32  ;;  %v1181_v62 = vrot.slane %v1180_v51, 2 }
 0x127   :  { %v1228_v0 = vrot.slane %v1227_v38, 2  ;;  %v1187_v2 = vadd.f32 %v1186_v57, %v1185_v41  ;;  %v1106_v5 = vmul.f32 %v1835_v39, %v1065_v32  ;;  %v1107_v8 = vmul.f32 %v1837_v40, %v1066_v34 }
 0x128   :  { %v1103_v63 = vmul.f32 %v1099_v46, %v1062_v25  ;;  %v1111_v1 = vmul.f32 %v1099_v46, %v1066_v34  ;;  %v1104_v4 = vadd.f32 %v1102_v59, %v1100_v47  ;;  %v1112_v6 = vmul.f32 3.0, %v1110_v60 }
 0x129   :  { %v1235_v9 = vrot.slane %v1234_v56, 2  ;;  %v1145_v48 = vsub.f32 1.0, %v1137_v58  ;;  %v1182_v3 = vadd.f32 %v1181_v62, %v1180_v51  ;;  %v1188_v12 = vrot.slane %v1187_v2, 2 }
 0x12a   :  { %v1105_v7 = vadd.f32 %v1103_v63, %v1101_v55  ;;  %v1108_v10 = vadd.f32 %v1106_v5, %v1104_v4  ;;  %v1113_v11 = vmul.f32 3.0, %v1111_v1  ;;  %v1229_v14 = vadd.f32 %v1228_v0, %v1227_v38 }
 0x12b   :  { %v1146_v52 = vsub.f32 1.0, %v1144_v61  ;;  %v1157_v50 = vmul.f32 %v1145_v48, %v1112_v6  ;;  %v1236_v39 = vadd.f32 %v1235_v9, %v1234_v56  ;;  %v1153_v53 = vmul.f32 %v1820_v17, %v1112_v6 }
 0x12c   :  { %v1109_v13 = vadd.f32 %v1107_v8, %v1105_v7  ;;  %v1147_v15 = vmul.f32 %v1820_v17, %v1108_v10  ;;  %v1149_v49 = vmul.f32 %v1145_v48, %v1108_v10  ;;  %v1183_v22 = vrot.slane %v1182_v3, 1 }
 0x12d   :  { %v1158_v21 = vmul.f32 %v1146_v52, %v1113_v11  ;;  %v1189_v23 = vadd.f32 %v1188_v12, %v1187_v2  ;;  %v1230_v25 = vrot.slane %v1229_v14, 1  ;;  %v1154_v27 = vmul.f32 %v1822_v18, %v1113_v11 }
 0x12e   :  { %v1148_v19 = vmul.f32 %v1822_v18, %v1109_v13  ;;  %v1150_v20 = vmul.f32 %v1146_v52, %v1109_v13  ;;  %v1151_v40 = vadd.f32 %v1149_v49, %v1147_v15  ;;  %v1159_v28 = vmul.f32 3.0, %v1157_v50 }
 0x12f   :  { %v1184_v29 = vadd.f32 %v1183_v22, %v1182_v3  ;;  %v1190_v31 = vrot.slane %v1189_v23, 1  ;;  %v1237_v54 = vrot.slane %v1236_v39, 1  ;;  %v1160_v35 = vmul.f32 3.0, %v1158_v21 }
 0x130   :  { %v1152_v26 = vadd.f32 %v1150_v20, %v1148_v19  ;;  %v1155_v33 = vadd.f32 %v1153_v53, %v1151_v40  ;;  %v1231_v17 = vadd.f32 %v1230_v25, %v1229_v14  ;;  %v1200_v46 = vmul.f32 %v1859_v24, %v1159_v28 }
 0x131   :  { %v1191_v36 = vadd.f32 %v1190_v31, %v1189_v23  ;;  %v1192_v34 = vsub.f32 1.0, %v1184_v29  ;;  %v1238_v51 = vadd.f32 %v1237_v54, %v1236_v39  ;;  %v1201_v59 = vmul.f32 %v1863_v30, %v1160_v35 }
 0x132   :  { %v1156_v32 = vadd.f32 %v1154_v27, %v1152_v26  ;;  %v1194_v37 = vmul.f32 %v1859_v24, %v1155_v33  ;;  %v1239_v56 = vsub.f32 1.0, %v1231_v17  ;;  %v1429_v23 = vmov 1966171168  }
 0x133   :  { %v1193_v38 = vsub.f32 1.0, %v1191_v36  ;;  %v1196_v42 = vmul.f32 %v1192_v34, %v1155_v33  ;;  %v1204_v47 = vmul.f32 %v1192_v34, %v1159_v28  ;;  %v1240_v62 = vsub.f32 1.0, %v1238_v51 }
 0x134   :  { %v1195_v41 = vmul.f32 %v1863_v30, %v1156_v32  ;;  %v1285_v25 = vunpack.c.l.s4 %v1429_v23 }
 0x135   :  { %v1197_v57 = vmul.f32 %v1193_v38, %v1156_v32  ;;  %v1198_v18 = vadd.f32 %v1196_v42, %v1194_v37  ;;  %v1205_v55 = vmul.f32 %v1193_v38, %v1160_v35  ;;  %v1206_v61 = vmul.f32 3.0, %v1204_v47 }
 0x136   :  { %v1286_v26 = vunpack.c.0.s8 %v1285_v25 }
 0x137   :  { %v1199_v58 = vadd.f32 %v1197_v57, %v1195_v41  ;;  %v1202_v60 = vadd.f32 %v1200_v46, %v1198_v18  ;;  %v1207_v0 = vmul.f32 3.0, %v1205_v55  ;;  %v1247_v7 = vmul.f32 %v1851_v16, %v1206_v61 }
 0x138   :  { %v1251_v52 = vmul.f32 %v1239_v56, %v1206_v61  ;;  %v1289_v32 = vsub.s32 %v1286_v26, %v1588_v44 }
 0x139   :  { %v1203_v63 = vadd.f32 %v1201_v59, %v1199_v58  ;;  %v1241_v1 = vmul.f32 %v1851_v16, %v1202_v60  ;;  %v1243_v2 = vmul.f32 %v1239_v56, %v1202_v60  ;;  %v1248_v8 = vmul.f32 %v1854_v45, %v1207_v0 }
 0x13a   :  { %v1252_v50 = vmul.f32 %v1240_v62, %v1207_v0  ;;  %v1253_v39 = vmul.f32 3.0, %v1251_v52 }
 0x13b   :  { %v1242_v4 = vmul.f32 %v1854_v45, %v1203_v63  ;;  %v1244_v5 = vmul.f32 %v1240_v62, %v1203_v63  ;;  %v1245_v6 = vadd.f32 %v1243_v2, %v1241_v1 }
 0x13c   :  { %v1254_v53 = vmul.f32 3.0, %v1252_v50 }
 0x13d   :  { %v1246_v24 = vadd.f32 %v1244_v5, %v1242_v4  ;;  %v1249_v9 = vadd.f32 %v1247_v7, %v1245_v6 }
 0x13f   :  { %v1250_v48 = vadd.f32 %v1248_v8, %v1246_v24  ;;  %v1255_v30 = vsel %vm909_vm0, %v1249_v9, 0.0 }
 0x140   :  { %v1256_v10 = vrot.slane %v1255_v30, 4 }
 0x141   :  { %v1262_v11 = vsel %vm909_vm0, %v1250_v48, 0.0 }
 0x142   :  { %v1257_v3 = vadd.f32 %v1256_v10, %v1255_v30  ;;  %v1263_v12 = vrot.slane %v1262_v11, 4 }
 0x144   :  { %v1258_v13 = vrot.slane %v1257_v3, 2  ;;  %v1264_v14 = vadd.f32 %v1263_v12, %v1262_v11 }
 0x146   :  { %v1259_v15 = vadd.f32 %v1258_v13, %v1257_v3  ;;  %v1265_v49 = vrot.slane %v1264_v14, 2 }
 0x148   :  { %v1260_v19 = vrot.slane %v1259_v15, 1  ;;  %v1266_v16 = vadd.f32 %v1265_v49, %v1264_v14 }
 0x14a   :  { %v1261_v20 = vadd.f32 %v1260_v19, %v1259_v15  ;;  %v1267_v45 = vrot.slane %v1266_v16, 1 }
 0x14c   :  { %v1268_v40 = vadd.f32 %v1267_v45, %v1266_v16  ;;  %v1269_v21 = vadd.f32 %v1261_v20, %v1253_v39 }
 0x14e   :  { %v1270_v22 = vadd.f32 %v1268_v40, %v1254_v53  ;;  %1402 = vrcp.f32 %v1269_v21 }
 0x150   :  { %1404 = vrcp.f32 %v1270_v22 }
 0x15b   :  { %v1403_v27 = vpop.eup %1402 }
 0x15c   :  { %v1275_v33 = vmul.f32 %v1403_v27, %v1249_v9  ;;  %v1279_v28 = vmul.f32 %v1403_v27, %v1253_v39 }
 0x15d   :  { %v1405_v29 = vpop.eup %1404 }
 0x15e   :  { %v1276_v31 = vmul.f32 %v1405_v29, %v1250_v48  ;;  %1277 = vst [vmem:[#allocation2] sm:$0xf] %v1275_v33  ;;  %v1280_v54 = vmul.f32 %v1405_v29, %v1254_v53 }
 0x160   :  { %1278 = vst [vmem:[#allocation2 + $0x8] sm:$0xf] %v1276_v31  ;;  %v1283_v35 = vcombine.low %v1279_v28, %v1280_v54 }
 0x162   :  { %v1290_v36 = vrot.slane %v1283_v35, %v1289_v32 }
 0x164   :  { %v1297_v34 = vrot.slane %v1290_v36, %v1289_v32 }
 0x166   :  { %1304 = vst.msk [vmem:[#allocation2 + $0x4] ss:$8 sm:$0x3] %vm1301_vm1, %v1297_v34 }
 0x167   :  { %1417 = shalt.err (!%p1414_p4)
}
 0x168   :  { %1315 = dma.vmem_to_hbm [thread:$0]  %s1313_s29, 256, %s1897_s5, [#allocation3]  }
 0x169   :  { %1426 = dma.done.wait [#allocation3], 256  }
 0x16a   :  { %1427 = vsyncadd [#allocation3], 4294967040 }
 0x16b   :  { %1319 = vsyncpa [#allocation3], 1 }

</bundles_post_ra>
